<compile_context>
chip_gen: v6e
topology: v6e:2x2x1
jax: 0.10.0
libtpu: 0.0.40
codegen_flags: <defaults>
</compile_context>

<pallas_src>
import functools
import math

import jax
import jax.numpy as jnp
from jax.experimental import pallas as pl
from jax.experimental.pallas import tpu as pltpu

# ----------------------------- model config (mini-BERT) -----------------------------
VOCAB = 128
HIDDEN = 128
LAYERS = 2
HEADS = 4
HEAD_DIM = HIDDEN // HEADS
INTERMEDIATE = 256
MAX_POS = 64
LN_EPS = 1e-12
PAD_OUT = 128  # classifier output padded to a full lane width; column 0 is the real logit


# ----------------------------- in-kernel helpers (traced inside the kernel) -----------------------------
def _layernorm(x, g, b, eps=LN_EPS):
    mean = jnp.mean(x, axis=-1, keepdims=True)
    var = jnp.mean((x - mean) * (x - mean), axis=-1, keepdims=True)
    return (x - mean) * jax.lax.rsqrt(var + jnp.float32(eps)) * g + b


def _gelu(y):
    # TODO(synk): PyTorch BertModel uses erf-GELU; tanh approximation keeps EUP-friendly lowering.
    c = jnp.float32(math.sqrt(2.0 / math.pi))
    return 0.5 * y * (1.0 + jnp.tanh(c * (y + 0.044715 * (y * y * y))))


def _bf16(x):
    return x.astype(jnp.bfloat16)


# ----------------------------- the single fused kernel -----------------------------
def _bert_forward_kernel(ids_ref, bias_ref, posadd_ref, wemb_ref, embg_ref, embb_ref,
                         wqkv_ref, bqkv_ref, wo_ref, bo_ref, ln1g_ref, ln1b_ref,
                         w1_ref, b1_ref, w2_ref, b2_ref, ln2g_ref, ln2b_ref,
                         poolw_ref, poolb_ref, fcw_ref, fcb_ref,
                         out_ref, x_ref, *, batch, seq):
    bs = batch * seq
    layer = pl.program_id(0)

    # ---- layer-0 prologue: in-VMEM embedding gather (one-hot matmul) + sum + LayerNorm ----
    @pl.when(layer == 0)
    def _():
        ids = ids_ref[...]                                                    # (BS, 1) int32
        lane_ids = jax.lax.broadcasted_iota(jnp.int32, (bs, VOCAB), 1)
        onehot = jnp.where(lane_ids == ids, 1.0, 0.0).astype(jnp.bfloat16)    # (BS, VOCAB)
        we = jnp.dot(onehot, wemb_ref[...], preferred_element_type=jnp.float32)
        x0 = we + posadd_ref[...]                                             # + position + token-type
        x_ref[...] = _layernorm(x0, embg_ref[...], embb_ref[...])

    x = x_ref[...]                                                            # (BS, H) f32, resident in VMEM
    bias = bias_ref[...]                                                      # (BS, BS) additive attention bias
    scale = jnp.float32(1.0 / math.sqrt(HEAD_DIM))

    # ---- fused QKV projection: one (BS, H) x (H, 3H) MXU pass ----
    qkv = jnp.dot(_bf16(x), wqkv_ref[0], preferred_element_type=jnp.float32) + bqkv_ref[0]
    q = qkv[:, :HIDDEN]
    k = qkv[:, HIDDEN:2 * HIDDEN]
    v = qkv[:, 2 * HIDDEN:]

    # ---- multi-head attention: per-head scores stacked on sublanes -> ONE softmax pass ----
    scores = []
    for h in range(HEADS):
        lo = h * HEAD_DIM
        s_h = jax.lax.dot_general(
            _bf16(q[:, lo:lo + HEAD_DIM]), _bf16(k[:, lo:lo + HEAD_DIM]),
            dimension_numbers=(((1,), (1,)), ((), ())),
            preferred_element_type=jnp.float32)                               # (BS, BS)
        scores.append(s_h * scale + bias)
    s_all = jnp.concatenate(scores, axis=0)                                   # (HEADS*BS, BS)
    s_all = s_all - jnp.max(s_all, axis=-1, keepdims=True)
    p_all = jnp.exp(s_all)
    p_all = p_all * pl.reciprocal(jnp.sum(p_all, axis=-1, keepdims=True), approx=True)
    p_all = _bf16(p_all)

    ctxs = []
    for h in range(HEADS):
        lo = h * HEAD_DIM
        ctxs.append(jnp.dot(p_all[h * bs:(h + 1) * bs, :], _bf16(v[:, lo:lo + HEAD_DIM]),
                            preferred_element_type=jnp.float32))              # (BS, Dh)
    ctx = jnp.concatenate(ctxs, axis=-1)                                      # (BS, H) = concat over heads

    # ---- single full-depth output projection + residual + LayerNorm1 ----
    attn = jnp.dot(_bf16(ctx), wo_ref[0], preferred_element_type=jnp.float32) + bo_ref[0]
    y = _layernorm(attn + x, ln1g_ref[0], ln1b_ref[0])

    # ---- feed-forward (GELU) + residual + LayerNorm2 ----
    h1 = _gelu(jnp.dot(_bf16(y), w1_ref[0], preferred_element_type=jnp.float32) + b1_ref[0])
    ffn = jnp.dot(_bf16(h1), w2_ref[0], preferred_element_type=jnp.float32) + b2_ref[0]
    x_out = _layernorm(ffn + y, ln2g_ref[0], ln2b_ref[0])
    x_ref[...] = x_out                                                        # carry to next layer in VMEM

    # ---- last-layer epilogue: pooler (CLS dense + tanh) + dropout(identity) + classifier + sigmoid ----
    @pl.when(layer == pl.num_programs(0) - 1)
    def _():
        pooled = jnp.tanh(jnp.dot(_bf16(x_out), poolw_ref[...],
                                  preferred_element_type=jnp.float32) + poolb_ref[...])   # (BS, H)
        logits = jnp.dot(_bf16(pooled), fcw_ref[...],
                         preferred_element_type=jnp.float32) + fcb_ref[...]               # (BS, PAD_OUT)
        probs = 1.0 / (1.0 + jnp.exp(-logits))
        for b in range(batch):                       # keep only the CLS (first-token) row per batch item
            out_ref[b:b + 1, :] = probs[b * seq:b * seq + 1, :].astype(out_ref.dtype)


# ----------------------------- parameter construction (stacked per-layer weights) -----------------------------
def init_params(key):
    def nrm(k, shape, scale=0.02):
        return (scale * jax.random.normal(k, shape)).astype(jnp.float32)

    ks = iter(jax.random.split(key, 32))
    fc_col = nrm(next(ks), (HIDDEN, 1))
    return {
        "word_emb": nrm(next(ks), (VOCAB, HIDDEN)).astype(jnp.bfloat16),
        "pos_emb": nrm(next(ks), (MAX_POS, HIDDEN)),
        "type_emb": nrm(next(ks), (2, HIDDEN)),
        "emb_ln_g": jnp.ones((1, HIDDEN), jnp.float32),
        "emb_ln_b": jnp.zeros((1, HIDDEN), jnp.float32),
        # per-layer weights stacked on a leading LAYERS dim (indexed by the layer grid axis)
        "wqkv": nrm(next(ks), (LAYERS, HIDDEN, 3 * HIDDEN)).astype(jnp.bfloat16),
        "bqkv": jnp.zeros((LAYERS, 1, 3 * HIDDEN), jnp.float32),
        "wo": nrm(next(ks), (LAYERS, HIDDEN, HIDDEN)).astype(jnp.bfloat16),
        "bo": jnp.zeros((LAYERS, 1, HIDDEN), jnp.float32),
        "ln1_g": jnp.ones((LAYERS, 1, HIDDEN), jnp.float32),
        "ln1_b": jnp.zeros((LAYERS, 1, HIDDEN), jnp.float32),
        "w1": nrm(next(ks), (LAYERS, HIDDEN, INTERMEDIATE)).astype(jnp.bfloat16),
        "b1": jnp.zeros((LAYERS, 1, INTERMEDIATE), jnp.float32),
        "w2": nrm(next(ks), (LAYERS, INTERMEDIATE, HIDDEN)).astype(jnp.bfloat16),
        "b2": jnp.zeros((LAYERS, 1, HIDDEN), jnp.float32),
        "ln2_g": jnp.ones((LAYERS, 1, HIDDEN), jnp.float32),
        "ln2_b": jnp.zeros((LAYERS, 1, HIDDEN), jnp.float32),
        # pooler + classifier (classifier weight padded to 128 lane-dense output columns)
        "pool_w": nrm(next(ks), (HIDDEN, HIDDEN)).astype(jnp.bfloat16),
        "pool_b": jnp.zeros((1, HIDDEN), jnp.float32),
        "fc_w": jnp.zeros((HIDDEN, PAD_OUT), jnp.float32).at[:, :1].set(fc_col).astype(jnp.bfloat16),
        "fc_b": jnp.zeros((1, PAD_OUT), jnp.float32),
    }


# ----------------------------- forward pass (one pallas_call) -----------------------------
def bert_classifier_forward(params, input_ids, attention_mask):
    # TODO(synk): tokenization (bert_preprocess.encode) is string processing with no Pallas
    # equivalent; the kernel consumes integer input_ids + attention_mask directly.
    B, S = input_ids.shape
    BS = B * S

    ids_col = input_ids.reshape(BS, 1).astype(jnp.int32)

    # Block-diagonal additive attention bias over the flattened (B*S) token axis:
    # 0 where (same batch item) AND (key not padded), -1e9 elsewhere.
    m = attention_mask.astype(jnp.float32)                                    # (B, S)
    eye = jnp.eye(B, dtype=jnp.float32)                                       # (Bq, Bk)
    allowed = eye[:, :, None] * m[None, :, :]                                 # (Bq, Bk, S)
    allowed = jnp.broadcast_to(allowed[:, None, :, :], (B, S, B, S)).reshape(BS, BS)
    attn_bias = (1.0 - allowed) * jnp.float32(-1e9)

    # position + token-type (=0) additive constant, pre-flattened to (BS, H)
    posadd = jnp.tile(params["pos_emb"][:S], (B, 1)) + params["type_emb"][0][None, :]

    def _full_spec(a, nd=None):
        nd = a.ndim if nd is None else nd
        return pl.BlockSpec(a.shape, lambda l, _nd=nd: (0,) * _nd)

    def _layer_spec(a):
        nd = a.ndim
        return pl.BlockSpec((1,) + a.shape[1:], lambda l, _nd=nd: (l,) + (0,) * (_nd - 1))

    in_specs = [
        _full_spec(ids_col), _full_spec(attn_bias), _full_spec(posadd),
        _full_spec(params["word_emb"]), _full_spec(params["emb_ln_g"]), _full_spec(params["emb_ln_b"]),
        _layer_spec(params["wqkv"]), _layer_spec(params["bqkv"]),
        _layer_spec(params["wo"]), _layer_spec(params["bo"]),
        _layer_spec(params["ln1_g"]), _layer_spec(params["ln1_b"]),
        _layer_spec(params["w1"]), _layer_spec(params["b1"]),
        _layer_spec(params["w2"]), _layer_spec(params["b2"]),
        _layer_spec(params["ln2_g"]), _layer_spec(params["ln2_b"]),
        _full_spec(params["pool_w"]), _full_spec(params["pool_b"]),
        _full_spec(params["fc_w"]), _full_spec(params["fc_b"]),
    ]

    out = pl.pallas_call(
        functools.partial(_bert_forward_kernel, batch=B, seq=S),
        out_shape=jax.ShapeDtypeStruct((B, PAD_OUT), jnp.float32),
        grid=(LAYERS,),
        in_specs=in_specs,
        out_specs=pl.BlockSpec((B, PAD_OUT), lambda l: (0, 0)),
        scratch_shapes=[pltpu.VMEM((BS, HIDDEN), jnp.float32)],  # activation resident across layers
        compiler_params=pltpu.CompilerParams(dimension_semantics=("arbitrary",)),
    )(ids_col, attn_bias, posadd,
      params["word_emb"], params["emb_ln_g"], params["emb_ln_b"],
      params["wqkv"], params["bqkv"], params["wo"], params["bo"],
      params["ln1_g"], params["ln1_b"], params["w1"], params["b1"],
      params["w2"], params["b2"], params["ln2_g"], params["ln2_b"],
      params["pool_w"], params["pool_b"], params["fc_w"], params["fc_b"])

    return out[:, :1]                                                         # real sigmoid output in column 0


# ----------------------------- main -----------------------------
if __name__ == "__main__":
    key = jax.random.PRNGKey(0)
    k_params, k_ids = jax.random.split(key)

    params = init_params(k_params)

    B, S = 2, 8
    input_ids = jax.random.randint(k_ids, (B, S), 0, VOCAB, dtype=jnp.int32)
    attention_mask = jnp.ones((B, S), dtype=jnp.int32)

    fwd = jax.jit(bert_classifier_forward)
    out = jax.block_until_ready(fwd(params, input_ids, attention_mask))
    assert out.shape == (B, 1)
    assert bool(jnp.all((out >= 0.0) & (out <= 1.0)))
    print("KERNEL_OK")
</pallas_src>

<mosaic_0001>
module attributes {stable_mosaic.version = 11 : i64} {
  func.func @_bert_forward_kernel(%arg0: i32, %arg1: memref<16x1xi32, #tpu.memory_space<vmem>>, %arg2: memref<16x16xf32, #tpu.memory_space<vmem>>, %arg3: memref<16x128xf32, #tpu.memory_space<vmem>>, %arg4: memref<128x128xbf16, #tpu.memory_space<vmem>>, %arg5: memref<1x128xf32, #tpu.memory_space<vmem>>, %arg6: memref<1x128xf32, #tpu.memory_space<vmem>>, %arg7: memref<1x128x384xbf16, #tpu.memory_space<vmem>>, %arg8: memref<1x1x384xf32, #tpu.memory_space<vmem>>, %arg9: memref<1x128x128xbf16, #tpu.memory_space<vmem>>, %arg10: memref<1x1x128xf32, #tpu.memory_space<vmem>>, %arg11: memref<1x1x128xf32, #tpu.memory_space<vmem>>, %arg12: memref<1x1x128xf32, #tpu.memory_space<vmem>>, %arg13: memref<1x128x256xbf16, #tpu.memory_space<vmem>>, %arg14: memref<1x1x256xf32, #tpu.memory_space<vmem>>, %arg15: memref<1x256x128xbf16, #tpu.memory_space<vmem>>, %arg16: memref<1x1x128xf32, #tpu.memory_space<vmem>>, %arg17: memref<1x1x128xf32, #tpu.memory_space<vmem>>, %arg18: memref<1x1x128xf32, #tpu.memory_space<vmem>>, %arg19: memref<128x128xbf16, #tpu.memory_space<vmem>>, %arg20: memref<1x128xf32, #tpu.memory_space<vmem>>, %arg21: memref<128x128xbf16, #tpu.memory_space<vmem>>, %arg22: memref<1x128xf32, #tpu.memory_space<vmem>>, %arg23: memref<2x128xf32, #tpu.memory_space<vmem>>, %arg24: memref<16x128xf32, #tpu.memory_space<vmem>>) attributes {dimension_semantics = [#tpu.dimension_semantics<arbitrary>], iteration_bounds = array<i64: 2>, scalar_prefetch = 0 : i64, scratch_operands = 1 : i64, tpu.core_type = #tpu.core_type<tc>, window_params = [{pipeline_mode = #tpu.pipeline_mode<synchronous>, transform_indices = @transform_0, window_bounds = array<i64: 16, 1>}, {pipeline_mode = #tpu.pipeline_mode<synchronous>, transform_indices = @transform_1, window_bounds = array<i64: 16, 16>}, {pipeline_mode = #tpu.pipeline_mode<synchronous>, transform_indices = @transform_2, window_bounds = array<i64: 16, 128>}, {pipeline_mode = #tpu.pipeline_mode<synchronous>, transform_indices = @transform_3, window_bounds = array<i64: 128, 128>}, {pipeline_mode = #tpu.pipeline_mode<synchronous>, transform_indices = @transform_4, window_bounds = array<i64: 1, 128>}, {pipeline_mode = #tpu.pipeline_mode<synchronous>, transform_indices = @transform_5, window_bounds = array<i64: 1, 128>}, {transform_indices = @transform_6, window_bounds = array<i64: 1, 128, 384>}, {transform_indices = @transform_7, window_bounds = array<i64: 1, 1, 384>}, {transform_indices = @transform_8, window_bounds = array<i64: 1, 128, 128>}, {transform_indices = @transform_9, window_bounds = array<i64: 1, 1, 128>}, {transform_indices = @transform_10, window_bounds = array<i64: 1, 1, 128>}, {transform_indices = @transform_11, window_bounds = array<i64: 1, 1, 128>}, {transform_indices = @transform_12, window_bounds = array<i64: 1, 128, 256>}, {transform_indices = @transform_13, window_bounds = array<i64: 1, 1, 256>}, {transform_indices = @transform_14, window_bounds = array<i64: 1, 256, 128>}, {transform_indices = @transform_15, window_bounds = array<i64: 1, 1, 128>}, {transform_indices = @transform_16, window_bounds = array<i64: 1, 1, 128>}, {transform_indices = @transform_17, window_bounds = array<i64: 1, 1, 128>}, {pipeline_mode = #tpu.pipeline_mode<synchronous>, transform_indices = @transform_18, window_bounds = array<i64: 128, 128>}, {pipeline_mode = #tpu.pipeline_mode<synchronous>, transform_indices = @transform_19, window_bounds = array<i64: 1, 128>}, {pipeline_mode = #tpu.pipeline_mode<synchronous>, transform_indices = @transform_20, window_bounds = array<i64: 128, 128>}, {pipeline_mode = #tpu.pipeline_mode<synchronous>, transform_indices = @transform_21, window_bounds = array<i64: 1, 128>}, {pipeline_mode = #tpu.pipeline_mode<synchronous>, transform_indices = @transform_22, window_bounds = array<i64: 2, 128>}]} {
    %c0_i32 = arith.constant 0 : i32
    %0 = arith.cmpi eq, %arg0, %c0_i32 : i32
    %1 = arith.extui %0 : i1 to i32
    %c0_i32_0 = arith.constant 0 : i32
    %2 = arith.cmpi ne, %1, %c0_i32_0 : i32
    scf.if %2 {
      %c0_74 = arith.constant 0 : index
      %c0_75 = arith.constant 0 : index
      %176 = vector.load %arg1[%c0_74, %c0_75] : memref<16x1xi32, #tpu.memory_space<vmem>>, vector<16x1xi32>
      %177 = tpu.iota {dimensions = array<i32: 1>} : vector<16x128xi32>
      %178 = vector.broadcast %176 : vector<16x1xi32> to vector<16x128xi32>
      %179 = arith.cmpi eq, %177, %178 : vector<16x128xi32>
      %cst_76 = arith.constant 1.000000e+00 : f32
      %cst_77 = arith.constant 0.000000e+00 : f32
      %180 = vector.broadcast %cst_76 : f32 to vector<16x128xf32>
      %181 = vector.broadcast %cst_77 : f32 to vector<16x128xf32>
      %182 = arith.select %179, %180, %181 : vector<16x128xi1>, vector<16x128xf32>
      %183 = arith.truncf %182 : vector<16x128xf32> to vector<16x128xbf16>
      %c0_78 = arith.constant 0 : index
      %c0_79 = arith.constant 0 : index
      %184 = vector.load %arg4[%c0_78, %c0_79] : memref<128x128xbf16, #tpu.memory_space<vmem>>, vector<128x128xbf16>
      %cst_80 = arith.constant dense<0.000000e+00> : vector<16x128xf32>
      %185 = tpu.matmul %183, %184, %cst_80 {dimension_numbers = #tpu.dot_dimension_numbers<[1], [0], [0], [1], [0, 0, 1, 1], [], []>} : vector<16x128xbf16>, vector<128x128xbf16>, vector<16x128xf32> -> vector<16x128xf32>
      %c0_81 = arith.constant 0 : index
      %c0_82 = arith.constant 0 : index
      %186 = vector.load %arg3[%c0_81, %c0_82] : memref<16x128xf32, #tpu.memory_space<vmem>>, vector<16x128xf32>
      %187 = arith.addf %185, %186 : vector<16x128xf32>
      %c0_83 = arith.constant 0 : index
      %c0_84 = arith.constant 0 : index
      %188 = vector.load %arg5[%c0_83, %c0_84] : memref<1x128xf32, #tpu.memory_space<vmem>>, vector<1x128xf32>
      %c0_85 = arith.constant 0 : index
      %c0_86 = arith.constant 0 : index
      %189 = vector.load %arg6[%c0_85, %c0_86] : memref<1x128xf32, #tpu.memory_space<vmem>>, vector<1x128xf32>
      %cst_87 = arith.constant dense<0.000000e+00> : vector<16xf32>
      %190 = vector.multi_reduction <add>, %187, %cst_87 [1] : vector<16x128xf32> to vector<16xf32>
      %191 = vector.shape_cast %190 : vector<16xf32> to vector<16x1xf32>
      %cst_88 = arith.constant 1.280000e+02 : f32
      %192 = vector.broadcast %cst_88 : f32 to vector<16x1xf32>
      %193 = arith.divf %191, %192 : vector<16x1xf32>
      %194 = vector.broadcast %193 : vector<16x1xf32> to vector<16x128xf32>
      %195 = arith.subf %187, %194 : vector<16x128xf32>
      %196 = vector.broadcast %193 : vector<16x1xf32> to vector<16x128xf32>
      %197 = arith.subf %187, %196 : vector<16x128xf32>
      %198 = arith.mulf %195, %197 : vector<16x128xf32>
      %cst_89 = arith.constant dense<0.000000e+00> : vector<16xf32>
      %199 = vector.multi_reduction <add>, %198, %cst_89 [1] : vector<16x128xf32> to vector<16xf32>
      %200 = vector.shape_cast %199 : vector<16xf32> to vector<16x1xf32>
      %cst_90 = arith.constant 1.280000e+02 : f32
      %201 = vector.broadcast %cst_90 : f32 to vector<16x1xf32>
      %202 = arith.divf %200, %201 : vector<16x1xf32>
      %203 = vector.broadcast %193 : vector<16x1xf32> to vector<16x128xf32>
      %204 = arith.subf %187, %203 : vector<16x128xf32>
      %cst_91 = arith.constant 9.99999996E-13 : f32
      %205 = vector.broadcast %cst_91 : f32 to vector<16x1xf32>
      %206 = arith.addf %202, %205 : vector<16x1xf32>
      %207 = math.rsqrt %206 : vector<16x1xf32>
      %208 = vector.broadcast %207 : vector<16x1xf32> to vector<16x128xf32>
      %209 = arith.mulf %204, %208 : vector<16x128xf32>
      %210 = vector.broadcast %188 : vector<1x128xf32> to vector<16x128xf32>
      %211 = arith.mulf %209, %210 : vector<16x128xf32>
      %212 = vector.broadcast %189 : vector<1x128xf32> to vector<16x128xf32>
      %213 = arith.addf %211, %212 : vector<16x128xf32>
      %c0_92 = arith.constant 0 : index
      %c0_93 = arith.constant 0 : index
      %214 = vector.load %arg24[%c0_92, %c0_93] : memref<16x128xf32, #tpu.memory_space<vmem>>, vector<16x128xf32>
      tpu.vector_store %arg24[%c0_92, %c0_93], %213 {strides = array<i32>} : memref<16x128xf32, #tpu.memory_space<vmem>>, vector<16x128xf32>,
    } else {
    }
    %c0 = arith.constant 0 : index
    %c0_1 = arith.constant 0 : index
    %3 = vector.load %arg24[%c0, %c0_1] : memref<16x128xf32, #tpu.memory_space<vmem>>, vector<16x128xf32>
    %c0_2 = arith.constant 0 : index
    %c0_3 = arith.constant 0 : index
    %4 = vector.load %arg2[%c0_2, %c0_3] : memref<16x16xf32, #tpu.memory_space<vmem>>, vector<16x16xf32>
    %5 = arith.truncf %3 : vector<16x128xf32> to vector<16x128xbf16>
    %c0_4 = arith.constant 0 : index
    %c0_5 = arith.constant 0 : index
    %c0_6 = arith.constant 0 : index
    %6 = vector.load %arg7[%c0_4, %c0_5, %c0_6] : memref<1x128x384xbf16, #tpu.memory_space<vmem>>, vector<1x128x384xbf16>
    %7 = vector.shape_cast %6 : vector<1x128x384xbf16> to vector<128x384xbf16>
    %cst = arith.constant dense<0.000000e+00> : vector<16x384xf32>
    %8 = tpu.matmul %5, %7, %cst {dimension_numbers = #tpu.dot_dimension_numbers<[1], [0], [0], [1], [0, 0, 1, 1], [], []>} : vector<16x128xbf16>, vector<128x384xbf16>, vector<16x384xf32> -> vector<16x384xf32>
    %c0_7 = arith.constant 0 : index
    %c0_8 = arith.constant 0 : index
    %c0_9 = arith.constant 0 : index
    %9 = vector.load %arg8[%c0_7, %c0_8, %c0_9] : memref<1x1x384xf32, #tpu.memory_space<vmem>>, vector<1x1x384xf32>
    %10 = vector.shape_cast %9 : vector<1x1x384xf32> to vector<1x384xf32>
    %11 = vector.broadcast %10 : vector<1x384xf32> to vector<16x384xf32>
    %12 = arith.addf %8, %11 : vector<16x384xf32>
    %13 = vector.extract_strided_slice %12 {offsets = [0, 0], sizes = [16, 128], strides = [1, 1]} : vector<16x384xf32> to vector<16x128xf32>
    %14 = vector.extract_strided_slice %12 {offsets = [0, 128], sizes = [16, 128], strides = [1, 1]} : vector<16x384xf32> to vector<16x128xf32>
    %15 = vector.extract_strided_slice %12 {offsets = [0, 256], sizes = [16, 128], strides = [1, 1]} : vector<16x384xf32> to vector<16x128xf32>
    %16 = vector.extract_strided_slice %13 {offsets = [0, 0], sizes = [16, 32], strides = [1, 1]} : vector<16x128xf32> to vector<16x32xf32>
    %17 = arith.truncf %16 : vector<16x32xf32> to vector<16x32xbf16>
    %18 = vector.extract_strided_slice %14 {offsets = [0, 0], sizes = [16, 32], strides = [1, 1]} : vector<16x128xf32> to vector<16x32xf32>
    %19 = arith.truncf %18 : vector<16x32xf32> to vector<16x32xbf16>
    %cst_10 = arith.constant dense<0.000000e+00> : vector<16x16xf32>
    %20 = tpu.matmul %17, %19, %cst_10 {dimension_numbers = #tpu.dot_dimension_numbers<[1], [1], [0], [0], [0, 0, 1, 0], [], []>} : vector<16x32xbf16>, vector<16x32xbf16>, vector<16x16xf32> -> vector<16x16xf32>
    %cst_11 = arith.constant 0.176776692 : f32
    %21 = vector.broadcast %cst_11 : f32 to vector<16x16xf32>
    %22 = arith.mulf %20, %21 : vector<16x16xf32>
    %23 = arith.addf %22, %4 : vector<16x16xf32>
    %24 = vector.extract_strided_slice %13 {offsets = [0, 32], sizes = [16, 32], strides = [1, 1]} : vector<16x128xf32> to vector<16x32xf32>
    %25 = arith.truncf %24 : vector<16x32xf32> to vector<16x32xbf16>
    %26 = vector.extract_strided_slice %14 {offsets = [0, 32], sizes = [16, 32], strides = [1, 1]} : vector<16x128xf32> to vector<16x32xf32>
    %27 = arith.truncf %26 : vector<16x32xf32> to vector<16x32xbf16>
    %cst_12 = arith.constant dense<0.000000e+00> : vector<16x16xf32>
    %28 = tpu.matmul %25, %27, %cst_12 {dimension_numbers = #tpu.dot_dimension_numbers<[1], [1], [0], [0], [0, 0, 1, 0], [], []>} : vector<16x32xbf16>, vector<16x32xbf16>, vector<16x16xf32> -> vector<16x16xf32>
    %cst_13 = arith.constant 0.176776692 : f32
    %29 = vector.broadcast %cst_13 : f32 to vector<16x16xf32>
    %30 = arith.mulf %28, %29 : vector<16x16xf32>
    %31 = arith.addf %30, %4 : vector<16x16xf32>
    %32 = vector.extract_strided_slice %13 {offsets = [0, 64], sizes = [16, 32], strides = [1, 1]} : vector<16x128xf32> to vector<16x32xf32>
    %33 = arith.truncf %32 : vector<16x32xf32> to vector<16x32xbf16>
    %34 = vector.extract_strided_slice %14 {offsets = [0, 64], sizes = [16, 32], strides = [1, 1]} : vector<16x128xf32> to vector<16x32xf32>
    %35 = arith.truncf %34 : vector<16x32xf32> to vector<16x32xbf16>
    %cst_14 = arith.constant dense<0.000000e+00> : vector<16x16xf32>
    %36 = tpu.matmul %33, %35, %cst_14 {dimension_numbers = #tpu.dot_dimension_numbers<[1], [1], [0], [0], [0, 0, 1, 0], [], []>} : vector<16x32xbf16>, vector<16x32xbf16>, vector<16x16xf32> -> vector<16x16xf32>
    %cst_15 = arith.constant 0.176776692 : f32
    %37 = vector.broadcast %cst_15 : f32 to vector<16x16xf32>
    %38 = arith.mulf %36, %37 : vector<16x16xf32>
    %39 = arith.addf %38, %4 : vector<16x16xf32>
    %40 = vector.extract_strided_slice %13 {offsets = [0, 96], sizes = [16, 32], strides = [1, 1]} : vector<16x128xf32> to vector<16x32xf32>
    %41 = arith.truncf %40 : vector<16x32xf32> to vector<16x32xbf16>
    %42 = vector.extract_strided_slice %14 {offsets = [0, 96], sizes = [16, 32], strides = [1, 1]} : vector<16x128xf32> to vector<16x32xf32>
    %43 = arith.truncf %42 : vector<16x32xf32> to vector<16x32xbf16>
    %cst_16 = arith.constant dense<0.000000e+00> : vector<16x16xf32>
    %44 = tpu.matmul %41, %43, %cst_16 {dimension_numbers = #tpu.dot_dimension_numbers<[1], [1], [0], [0], [0, 0, 1, 0], [], []>} : vector<16x32xbf16>, vector<16x32xbf16>, vector<16x16xf32> -> vector<16x16xf32>
    %cst_17 = arith.constant 0.176776692 : f32
    %45 = vector.broadcast %cst_17 : f32 to vector<16x16xf32>
    %46 = arith.mulf %44, %45 : vector<16x16xf32>
    %47 = arith.addf %46, %4 : vector<16x16xf32>
    %48 = tpu.concatenate %23, %31, %39, %47 in 0 : vector<16x16xf32>, vector<16x16xf32>, vector<16x16xf32>, vector<16x16xf32> -> vector<64x16xf32>
    %cst_18 = arith.constant dense<0xFF800000> : vector<64xf32>
    %49 = vector.multi_reduction <maximumf>, %48, %cst_18 [1] : vector<64x16xf32> to vector<64xf32>
    %50 = vector.shape_cast %49 : vector<64xf32> to vector<64x1xf32>
    %51 = vector.broadcast %50 : vector<64x1xf32> to vector<64x16xf32>
    %52 = arith.subf %48, %51 : vector<64x16xf32>
    %53 = math.exp %52 : vector<64x16xf32>
    %cst_19 = arith.constant dense<0.000000e+00> : vector<64xf32>
    %54 = vector.multi_reduction <add>, %53, %cst_19 [1] : vector<64x16xf32> to vector<64xf32>
    %55 = vector.shape_cast %54 : vector<64xf32> to vector<64x1xf32>
    %56 = tpu.reciprocal %55 {approx = true} : vector<64x1xf32> -> vector<64x1xf32>
    %57 = vector.broadcast %56 : vector<64x1xf32> to vector<64x16xf32>
    %58 = arith.mulf %53, %57 : vector<64x16xf32>
    %59 = arith.truncf %58 : vector<64x16xf32> to vector<64x16xbf16>
    %60 = vector.extract_strided_slice %59 {offsets = [0, 0], sizes = [16, 16], strides = [1, 1]} : vector<64x16xbf16> to vector<16x16xbf16>
    %61 = vector.extract_strided_slice %15 {offsets = [0, 0], sizes = [16, 32], strides = [1, 1]} : vector<16x128xf32> to vector<16x32xf32>
    %62 = arith.truncf %61 : vector<16x32xf32> to vector<16x32xbf16>
    %cst_20 = arith.constant dense<0.000000e+00> : vector<16x32xf32>
    %63 = tpu.matmul %60, %62, %cst_20 {dimension_numbers = #tpu.dot_dimension_numbers<[1], [0], [0], [1], [0, 0, 1, 1], [], []>} : vector<16x16xbf16>, vector<16x32xbf16>, vector<16x32xf32> -> vector<16x32xf32>
    %64 = vector.extract_strided_slice %59 {offsets = [16, 0], sizes = [16, 16], strides = [1, 1]} : vector<64x16xbf16> to vector<16x16xbf16>
    %65 = vector.extract_strided_slice %15 {offsets = [0, 32], sizes = [16, 32], strides = [1, 1]} : vector<16x128xf32> to vector<16x32xf32>
    %66 = arith.truncf %65 : vector<16x32xf32> to vector<16x32xbf16>
    %cst_21 = arith.constant dense<0.000000e+00> : vector<16x32xf32>
    %67 = tpu.matmul %64, %66, %cst_21 {dimension_numbers = #tpu.dot_dimension_numbers<[1], [0], [0], [1], [0, 0, 1, 1], [], []>} : vector<16x16xbf16>, vector<16x32xbf16>, vector<16x32xf32> -> vector<16x32xf32>
    %68 = vector.extract_strided_slice %59 {offsets = [32, 0], sizes = [16, 16], strides = [1, 1]} : vector<64x16xbf16> to vector<16x16xbf16>
    %69 = vector.extract_strided_slice %15 {offsets = [0, 64], sizes = [16, 32], strides = [1, 1]} : vector<16x128xf32> to vector<16x32xf32>
    %70 = arith.truncf %69 : vector<16x32xf32> to vector<16x32xbf16>
    %cst_22 = arith.constant dense<0.000000e+00> : vector<16x32xf32>
    %71 = tpu.matmul %68, %70, %cst_22 {dimension_numbers = #tpu.dot_dimension_numbers<[1], [0], [0], [1], [0, 0, 1, 1], [], []>} : vector<16x16xbf16>, vector<16x32xbf16>, vector<16x32xf32> -> vector<16x32xf32>
    %72 = vector.extract_strided_slice %59 {offsets = [48, 0], sizes = [16, 16], strides = [1, 1]} : vector<64x16xbf16> to vector<16x16xbf16>
    %73 = vector.extract_strided_slice %15 {offsets = [0, 96], sizes = [16, 32], strides = [1, 1]} : vector<16x128xf32> to vector<16x32xf32>
    %74 = arith.truncf %73 : vector<16x32xf32> to vector<16x32xbf16>
    %cst_23 = arith.constant dense<0.000000e+00> : vector<16x32xf32>
    %75 = tpu.matmul %72, %74, %cst_23 {dimension_numbers = #tpu.dot_dimension_numbers<[1], [0], [0], [1], [0, 0, 1, 1], [], []>} : vector<16x16xbf16>, vector<16x32xbf16>, vector<16x32xf32> -> vector<16x32xf32>
    %76 = tpu.concatenate %63, %67, %71, %75 in 1 : vector<16x32xf32>, vector<16x32xf32>, vector<16x32xf32>, vector<16x32xf32> -> vector<16x128xf32>
    %77 = arith.truncf %76 : vector<16x128xf32> to vector<16x128xbf16>
    %c0_24 = arith.constant 0 : index
    %c0_25 = arith.constant 0 : index
    %c0_26 = arith.constant 0 : index
    %78 = vector.load %arg9[%c0_24, %c0_25, %c0_26] : memref<1x128x128xbf16, #tpu.memory_space<vmem>>, vector<1x128x128xbf16>
    %79 = vector.shape_cast %78 : vector<1x128x128xbf16> to vector<128x128xbf16>
    %cst_27 = arith.constant dense<0.000000e+00> : vector<16x128xf32>
    %80 = tpu.matmul %77, %79, %cst_27 {dimension_numbers = #tpu.dot_dimension_numbers<[1], [0], [0], [1], [0, 0, 1, 1], [], []>} : vector<16x128xbf16>, vector<128x128xbf16>, vector<16x128xf32> -> vector<16x128xf32>
    %c0_28 = arith.constant 0 : index
    %c0_29 = arith.constant 0 : index
    %c0_30 = arith.constant 0 : index
    %81 = vector.load %arg10[%c0_28, %c0_29, %c0_30] : memref<1x1x128xf32, #tpu.memory_space<vmem>>, vector<1x1x128xf32>
    %82 = vector.shape_cast %81 : vector<1x1x128xf32> to vector<1x128xf32>
    %83 = vector.broadcast %82 : vector<1x128xf32> to vector<16x128xf32>
    %84 = arith.addf %80, %83 : vector<16x128xf32>
    %85 = arith.addf %84, %3 : vector<16x128xf32>
    %c0_31 = arith.constant 0 : index
    %c0_32 = arith.constant 0 : index
    %c0_33 = arith.constant 0 : index
    %86 = vector.load %arg11[%c0_31, %c0_32, %c0_33] : memref<1x1x128xf32, #tpu.memory_space<vmem>>, vector<1x1x128xf32>
    %87 = vector.shape_cast %86 : vector<1x1x128xf32> to vector<1x128xf32>
    %c0_34 = arith.constant 0 : index
    %c0_35 = arith.constant 0 : index
    %c0_36 = arith.constant 0 : index
    %88 = vector.load %arg12[%c0_34, %c0_35, %c0_36] : memref<1x1x128xf32, #tpu.memory_space<vmem>>, vector<1x1x128xf32>
    %89 = vector.shape_cast %88 : vector<1x1x128xf32> to vector<1x128xf32>
    %cst_37 = arith.constant dense<0.000000e+00> : vector<16xf32>
    %90 = vector.multi_reduction <add>, %85, %cst_37 [1] : vector<16x128xf32> to vector<16xf32>
    %91 = vector.shape_cast %90 : vector<16xf32> to vector<16x1xf32>
    %cst_38 = arith.constant 1.280000e+02 : f32
    %92 = vector.broadcast %cst_38 : f32 to vector<16x1xf32>
    %93 = arith.divf %91, %92 : vector<16x1xf32>
    %94 = vector.broadcast %93 : vector<16x1xf32> to vector<16x128xf32>
    %95 = arith.subf %85, %94 : vector<16x128xf32>
    %96 = vector.broadcast %93 : vector<16x1xf32> to vector<16x128xf32>
    %97 = arith.subf %85, %96 : vector<16x128xf32>
    %98 = arith.mulf %95, %97 : vector<16x128xf32>
    %cst_39 = arith.constant dense<0.000000e+00> : vector<16xf32>
    %99 = vector.multi_reduction <add>, %98, %cst_39 [1] : vector<16x128xf32> to vector<16xf32>
    %100 = vector.shape_cast %99 : vector<16xf32> to vector<16x1xf32>
    %cst_40 = arith.constant 1.280000e+02 : f32
    %101 = vector.broadcast %cst_40 : f32 to vector<16x1xf32>
    %102 = arith.divf %100, %101 : vector<16x1xf32>
    %103 = vector.broadcast %93 : vector<16x1xf32> to vector<16x128xf32>
    %104 = arith.subf %85, %103 : vector<16x128xf32>
    %cst_41 = arith.constant 9.99999996E-13 : f32
    %105 = vector.broadcast %cst_41 : f32 to vector<16x1xf32>
    %106 = arith.addf %102, %105 : vector<16x1xf32>
    %107 = math.rsqrt %106 : vector<16x1xf32>
    %108 = vector.broadcast %107 : vector<16x1xf32> to vector<16x128xf32>
    %109 = arith.mulf %104, %108 : vector<16x128xf32>
    %110 = vector.broadcast %87 : vector<1x128xf32> to vector<16x128xf32>
    %111 = arith.mulf %109, %110 : vector<16x128xf32>
    %112 = vector.broadcast %89 : vector<1x128xf32> to vector<16x128xf32>
    %113 = arith.addf %111, %112 : vector<16x128xf32>
    %114 = arith.truncf %113 : vector<16x128xf32> to vector<16x128xbf16>
    %c0_42 = arith.constant 0 : index
    %c0_43 = arith.constant 0 : index
    %c0_44 = arith.constant 0 : index
    %115 = vector.load %arg13[%c0_42, %c0_43, %c0_44] : memref<1x128x256xbf16, #tpu.memory_space<vmem>>, vector<1x128x256xbf16>
    %116 = vector.shape_cast %115 : vector<1x128x256xbf16> to vector<128x256xbf16>
    %cst_45 = arith.constant dense<0.000000e+00> : vector<16x256xf32>
    %117 = tpu.matmul %114, %116, %cst_45 {dimension_numbers = #tpu.dot_dimension_numbers<[1], [0], [0], [1], [0, 0, 1, 1], [], []>} : vector<16x128xbf16>, vector<128x256xbf16>, vector<16x256xf32> -> vector<16x256xf32>
    %c0_46 = arith.constant 0 : index
    %c0_47 = arith.constant 0 : index
    %c0_48 = arith.constant 0 : index
    %118 = vector.load %arg14[%c0_46, %c0_47, %c0_48] : memref<1x1x256xf32, #tpu.memory_space<vmem>>, vector<1x1x256xf32>
    %119 = vector.shape_cast %118 : vector<1x1x256xf32> to vector<1x256xf32>
    %120 = vector.broadcast %119 : vector<1x256xf32> to vector<16x256xf32>
    %121 = arith.addf %117, %120 : vector<16x256xf32>
    %cst_49 = arith.constant 5.000000e-01 : f32
    %122 = vector.broadcast %cst_49 : f32 to vector<16x256xf32>
    %123 = arith.mulf %122, %121 : vector<16x256xf32>
    %124 = arith.mulf %121, %121 : vector<16x256xf32>
    %125 = arith.mulf %124, %121 : vector<16x256xf32>
    %cst_50 = arith.constant 4.471500e-02 : f32
    %126 = vector.broadcast %cst_50 : f32 to vector<16x256xf32>
    %127 = arith.mulf %126, %125 : vector<16x256xf32>
    %128 = arith.addf %121, %127 : vector<16x256xf32>
    %cst_51 = arith.constant 0.797884583 : f32
    %129 = vector.broadcast %cst_51 : f32 to vector<16x256xf32>
    %130 = arith.mulf %129, %128 : vector<16x256xf32>
    %131 = math.tanh %130 : vector<16x256xf32>
    %cst_52 = arith.constant 1.000000e+00 : f32
    %132 = vector.broadcast %cst_52 : f32 to vector<16x256xf32>
    %133 = arith.addf %132, %131 : vector<16x256xf32>
    %134 = arith.mulf %123, %133 : vector<16x256xf32>
    %135 = arith.truncf %134 : vector<16x256xf32> to vector<16x256xbf16>
    %c0_53 = arith.constant 0 : index
    %c0_54 = arith.constant 0 : index
    %c0_55 = arith.constant 0 : index
    %136 = vector.load %arg15[%c0_53, %c0_54, %c0_55] : memref<1x256x128xbf16, #tpu.memory_space<vmem>>, vector<1x256x128xbf16>
    %137 = vector.shape_cast %136 : vector<1x256x128xbf16> to vector<256x128xbf16>
    %cst_56 = arith.constant dense<0.000000e+00> : vector<16x128xf32>
    %138 = tpu.matmul %135, %137, %cst_56 {dimension_numbers = #tpu.dot_dimension_numbers<[1], [0], [0], [1], [0, 0, 1, 1], [], []>} : vector<16x256xbf16>, vector<256x128xbf16>, vector<16x128xf32> -> vector<16x128xf32>
    %c0_57 = arith.constant 0 : index
    %c0_58 = arith.constant 0 : index
    %c0_59 = arith.constant 0 : index
    %139 = vector.load %arg16[%c0_57, %c0_58, %c0_59] : memref<1x1x128xf32, #tpu.memory_space<vmem>>, vector<1x1x128xf32>
    %140 = vector.shape_cast %139 : vector<1x1x128xf32> to vector<1x128xf32>
    %141 = vector.broadcast %140 : vector<1x128xf32> to vector<16x128xf32>
    %142 = arith.addf %138, %141 : vector<16x128xf32>
    %143 = arith.addf %142, %113 : vector<16x128xf32>
    %c0_60 = arith.constant 0 : index
    %c0_61 = arith.constant 0 : index
    %c0_62 = arith.constant 0 : index
    %144 = vector.load %arg17[%c0_60, %c0_61, %c0_62] : memref<1x1x128xf32, #tpu.memory_space<vmem>>, vector<1x1x128xf32>
    %145 = vector.shape_cast %144 : vector<1x1x128xf32> to vector<1x128xf32>
    %c0_63 = arith.constant 0 : index
    %c0_64 = arith.constant 0 : index
    %c0_65 = arith.constant 0 : index
    %146 = vector.load %arg18[%c0_63, %c0_64, %c0_65] : memref<1x1x128xf32, #tpu.memory_space<vmem>>, vector<1x1x128xf32>
    %147 = vector.shape_cast %146 : vector<1x1x128xf32> to vector<1x128xf32>
    %cst_66 = arith.constant dense<0.000000e+00> : vector<16xf32>
    %148 = vector.multi_reduction <add>, %143, %cst_66 [1] : vector<16x128xf32> to vector<16xf32>
    %149 = vector.shape_cast %148 : vector<16xf32> to vector<16x1xf32>
    %cst_67 = arith.constant 1.280000e+02 : f32
    %150 = vector.broadcast %cst_67 : f32 to vector<16x1xf32>
    %151 = arith.divf %149, %150 : vector<16x1xf32>
    %152 = vector.broadcast %151 : vector<16x1xf32> to vector<16x128xf32>
    %153 = arith.subf %143, %152 : vector<16x128xf32>
    %154 = vector.broadcast %151 : vector<16x1xf32> to vector<16x128xf32>
    %155 = arith.subf %143, %154 : vector<16x128xf32>
    %156 = arith.mulf %153, %155 : vector<16x128xf32>
    %cst_68 = arith.constant dense<0.000000e+00> : vector<16xf32>
    %157 = vector.multi_reduction <add>, %156, %cst_68 [1] : vector<16x128xf32> to vector<16xf32>
    %158 = vector.shape_cast %157 : vector<16xf32> to vector<16x1xf32>
    %cst_69 = arith.constant 1.280000e+02 : f32
    %159 = vector.broadcast %cst_69 : f32 to vector<16x1xf32>
    %160 = arith.divf %158, %159 : vector<16x1xf32>
    %161 = vector.broadcast %151 : vector<16x1xf32> to vector<16x128xf32>
    %162 = arith.subf %143, %161 : vector<16x128xf32>
    %cst_70 = arith.constant 9.99999996E-13 : f32
    %163 = vector.broadcast %cst_70 : f32 to vector<16x1xf32>
    %164 = arith.addf %160, %163 : vector<16x1xf32>
    %165 = math.rsqrt %164 : vector<16x1xf32>
    %166 = vector.broadcast %165 : vector<16x1xf32> to vector<16x128xf32>
    %167 = arith.mulf %162, %166 : vector<16x128xf32>
    %168 = vector.broadcast %145 : vector<1x128xf32> to vector<16x128xf32>
    %169 = arith.mulf %167, %168 : vector<16x128xf32>
    %170 = vector.broadcast %147 : vector<1x128xf32> to vector<16x128xf32>
    %171 = arith.addf %169, %170 : vector<16x128xf32>
    %c0_71 = arith.constant 0 : index
    %c0_72 = arith.constant 0 : index
    %172 = vector.load %arg24[%c0_71, %c0_72] : memref<16x128xf32, #tpu.memory_space<vmem>>, vector<16x128xf32>
    tpu.vector_store %arg24[%c0_71, %c0_72], %171 {strides = array<i32>} : memref<16x128xf32, #tpu.memory_space<vmem>>, vector<16x128xf32>,
    %c1_i32 = arith.constant 1 : i32
    %173 = arith.cmpi eq, %arg0, %c1_i32 : i32
    %174 = arith.extui %173 : i1 to i32
    %c0_i32_73 = arith.constant 0 : i32
    %175 = arith.cmpi ne, %174, %c0_i32_73 : i32
    scf.if %175 {
      %176 = arith.truncf %171 : vector<16x128xf32> to vector<16x128xbf16>
      %c0_74 = arith.constant 0 : index
      %c0_75 = arith.constant 0 : index
      %177 = vector.load %arg19[%c0_74, %c0_75] : memref<128x128xbf16, #tpu.memory_space<vmem>>, vector<128x128xbf16>
      %cst_76 = arith.constant dense<0.000000e+00> : vector<16x128xf32>
      %178 = tpu.matmul %176, %177, %cst_76 {dimension_numbers = #tpu.dot_dimension_numbers<[1], [0], [0], [1], [0, 0, 1, 1], [], []>} : vector<16x128xbf16>, vector<128x128xbf16>, vector<16x128xf32> -> vector<16x128xf32>
      %c0_77 = arith.constant 0 : index
      %c0_78 = arith.constant 0 : index
      %179 = vector.load %arg20[%c0_77, %c0_78] : memref<1x128xf32, #tpu.memory_space<vmem>>, vector<1x128xf32>
      %180 = vector.broadcast %179 : vector<1x128xf32> to vector<16x128xf32>
      %181 = arith.addf %178, %180 : vector<16x128xf32>
      %182 = math.tanh %181 : vector<16x128xf32>
      %183 = arith.truncf %182 : vector<16x128xf32> to vector<16x128xbf16>
      %c0_79 = arith.constant 0 : index
      %c0_80 = arith.constant 0 : index
      %184 = vector.load %arg21[%c0_79, %c0_80] : memref<128x128xbf16, #tpu.memory_space<vmem>>, vector<128x128xbf16>
      %cst_81 = arith.constant dense<0.000000e+00> : vector<16x128xf32>
      %185 = tpu.matmul %183, %184, %cst_81 {dimension_numbers = #tpu.dot_dimension_numbers<[1], [0], [0], [1], [0, 0, 1, 1], [], []>} : vector<16x128xbf16>, vector<128x128xbf16>, vector<16x128xf32> -> vector<16x128xf32>
      %c0_82 = arith.constant 0 : index
      %c0_83 = arith.constant 0 : index
      %186 = vector.load %arg22[%c0_82, %c0_83] : memref<1x128xf32, #tpu.memory_space<vmem>>, vector<1x128xf32>
      %187 = vector.broadcast %186 : vector<1x128xf32> to vector<16x128xf32>
      %188 = arith.addf %185, %187 : vector<16x128xf32>
      %cst_84 = arith.constant 0.000000e+00 : f32
      %189 = vector.broadcast %cst_84 : f32 to vector<16x128xf32>
      %190 = arith.subf %189, %188 : vector<16x128xf32>
      %191 = math.exp %190 : vector<16x128xf32>
      %cst_85 = arith.constant 1.000000e+00 : f32
      %192 = vector.broadcast %cst_85 : f32 to vector<16x128xf32>
      %193 = arith.addf %192, %191 : vector<16x128xf32>
      %cst_86 = arith.constant 1.000000e+00 : f32
      %194 = vector.broadcast %cst_86 : f32 to vector<16x128xf32>
      %195 = arith.divf %194, %193 : vector<16x128xf32>
      %196 = vector.extract_strided_slice %195 {offsets = [0, 0], sizes = [1, 128], strides = [1, 1]} : vector<16x128xf32> to vector<1x128xf32>
      %c0_87 = arith.constant 0 : index
      %c0_88 = arith.constant 0 : index
      %197 = vector.load %arg23[%c0_87, %c0_88] : memref<2x128xf32, #tpu.memory_space<vmem>>, vector<1x128xf32>
      tpu.vector_store %arg23[%c0_87, %c0_88], %196 {strides = array<i32>} : memref<2x128xf32, #tpu.memory_space<vmem>>, vector<1x128xf32>,
      %198 = vector.extract_strided_slice %195 {offsets = [8, 0], sizes = [1, 128], strides = [1, 1]} : vector<16x128xf32> to vector<1x128xf32>
      %c1 = arith.constant 1 : index
      %c0_89 = arith.constant 0 : index
      %199 = vector.load %arg23[%c1, %c0_89] : memref<2x128xf32, #tpu.memory_space<vmem>>, vector<1x128xf32>
      tpu.vector_store %arg23[%c1, %c0_89], %198 {strides = array<i32>} : memref<2x128xf32, #tpu.memory_space<vmem>>, vector<1x128xf32>,
    } else {
    }
    return
  }
  func.func @transform_0(%arg0: i32) -> (i32, i32) {
    %c0_i32 = arith.constant 0 : i32
    %c0_i32_0 = arith.constant 0 : i32
    %c0_i32_1 = arith.constant 0 : i32
    return %c0_i32, %c0_i32_0 : i32, i32
  }
  func.func @transform_1(%arg0: i32) -> (i32, i32) {
    %c0_i32 = arith.constant 0 : i32
    %c0_i32_0 = arith.constant 0 : i32
    %c0_i32_1 = arith.constant 0 : i32
    return %c0_i32, %c0_i32_0 : i32, i32
  }
  func.func @transform_2(%arg0: i32) -> (i32, i32) {
    %c0_i32 = arith.constant 0 : i32
    %c0_i32_0 = arith.constant 0 : i32
    %c0_i32_1 = arith.constant 0 : i32
    return %c0_i32, %c0_i32_0 : i32, i32
  }
  func.func @transform_3(%arg0: i32) -> (i32, i32) {
    %c0_i32 = arith.constant 0 : i32
    %c0_i32_0 = arith.constant 0 : i32
    %c0_i32_1 = arith.constant 0 : i32
    return %c0_i32, %c0_i32_0 : i32, i32
  }
  func.func @transform_4(%arg0: i32) -> (i32, i32) {
    %c0_i32 = arith.constant 0 : i32
    %c0_i32_0 = arith.constant 0 : i32
    %c0_i32_1 = arith.constant 0 : i32
    return %c0_i32, %c0_i32_0 : i32, i32
  }
  func.func @transform_5(%arg0: i32) -> (i32, i32) {
    %c0_i32 = arith.constant 0 : i32
    %c0_i32_0 = arith.constant 0 : i32
    %c0_i32_1 = arith.constant 0 : i32
    return %c0_i32, %c0_i32_0 : i32, i32
  }
  func.func @transform_6(%arg0: i32) -> (i32, i32, i32) {
    %c0_i32 = arith.constant 0 : i32
    %c0_i32_0 = arith.constant 0 : i32
    %c0_i32_1 = arith.constant 0 : i32
    return %arg0, %c0_i32, %c0_i32_0 : i32, i32, i32
  }
  func.func @transform_7(%arg0: i32) -> (i32, i32, i32) {
    %c0_i32 = arith.constant 0 : i32
    %c0_i32_0 = arith.constant 0 : i32
    %c0_i32_1 = arith.constant 0 : i32
    return %arg0, %c0_i32, %c0_i32_0 : i32, i32, i32
  }
  func.func @transform_8(%arg0: i32) -> (i32, i32, i32) {
    %c0_i32 = arith.constant 0 : i32
    %c0_i32_0 = arith.constant 0 : i32
    %c0_i32_1 = arith.constant 0 : i32
    return %arg0, %c0_i32, %c0_i32_0 : i32, i32, i32
  }
  func.func @transform_9(%arg0: i32) -> (i32, i32, i32) {
    %c0_i32 = arith.constant 0 : i32
    %c0_i32_0 = arith.constant 0 : i32
    %c0_i32_1 = arith.constant 0 : i32
    return %arg0, %c0_i32, %c0_i32_0 : i32, i32, i32
  }
  func.func @transform_10(%arg0: i32) -> (i32, i32, i32) {
    %c0_i32 = arith.constant 0 : i32
    %c0_i32_0 = arith.constant 0 : i32
    %c0_i32_1 = arith.constant 0 : i32
    return %arg0, %c0_i32, %c0_i32_0 : i32, i32, i32
  }
  func.func @transform_11(%arg0: i32) -> (i32, i32, i32) {
    %c0_i32 = arith.constant 0 : i32
    %c0_i32_0 = arith.constant 0 : i32
    %c0_i32_1 = arith.constant 0 : i32
    return %arg0, %c0_i32, %c0_i32_0 : i32, i32, i32
  }
  func.func @transform_12(%arg0: i32) -> (i32, i32, i32) {
    %c0_i32 = arith.constant 0 : i32
    %c0_i32_0 = arith.constant 0 : i32
    %c0_i32_1 = arith.constant 0 : i32
    return %arg0, %c0_i32, %c0_i32_0 : i32, i32, i32
  }
  func.func @transform_13(%arg0: i32) -> (i32, i32, i32) {
    %c0_i32 = arith.constant 0 : i32
    %c0_i32_0 = arith.constant 0 : i32
    %c0_i32_1 = arith.constant 0 : i32
    return %arg0, %c0_i32, %c0_i32_0 : i32, i32, i32
  }
  func.func @transform_14(%arg0: i32) -> (i32, i32, i32) {
    %c0_i32 = arith.constant 0 : i32
    %c0_i32_0 = arith.constant 0 : i32
    %c0_i32_1 = arith.constant 0 : i32
    return %arg0, %c0_i32, %c0_i32_0 : i32, i32, i32
  }
  func.func @transform_15(%arg0: i32) -> (i32, i32, i32) {
    %c0_i32 = arith.constant 0 : i32
    %c0_i32_0 = arith.constant 0 : i32
    %c0_i32_1 = arith.constant 0 : i32
    return %arg0, %c0_i32, %c0_i32_0 : i32, i32, i32
  }
  func.func @transform_16(%arg0: i32) -> (i32, i32, i32) {
    %c0_i32 = arith.constant 0 : i32
    %c0_i32_0 = arith.constant 0 : i32
    %c0_i32_1 = arith.constant 0 : i32
    return %arg0, %c0_i32, %c0_i32_0 : i32, i32, i32
  }
  func.func @transform_17(%arg0: i32) -> (i32, i32, i32) {
    %c0_i32 = arith.constant 0 : i32
    %c0_i32_0 = arith.constant 0 : i32
    %c0_i32_1 = arith.constant 0 : i32
    return %arg0, %c0_i32, %c0_i32_0 : i32, i32, i32
  }
  func.func @transform_18(%arg0: i32) -> (i32, i32) {
    %c0_i32 = arith.constant 0 : i32
    %c0_i32_0 = arith.constant 0 : i32
    %c0_i32_1 = arith.constant 0 : i32
    return %c0_i32, %c0_i32_0 : i32, i32
  }
  func.func @transform_19(%arg0: i32) -> (i32, i32) {
    %c0_i32 = arith.constant 0 : i32
    %c0_i32_0 = arith.constant 0 : i32
    %c0_i32_1 = arith.constant 0 : i32
    return %c0_i32, %c0_i32_0 : i32, i32
  }
  func.func @transform_20(%arg0: i32) -> (i32, i32) {
    %c0_i32 = arith.constant 0 : i32
    %c0_i32_0 = arith.constant 0 : i32
    %c0_i32_1 = arith.constant 0 : i32
    return %c0_i32, %c0_i32_0 : i32, i32
  }
  func.func @transform_21(%arg0: i32) -> (i32, i32) {
    %c0_i32 = arith.constant 0 : i32
    %c0_i32_0 = arith.constant 0 : i32
    %c0_i32_1 = arith.constant 0 : i32
    return %c0_i32, %c0_i32_0 : i32, i32
  }
  func.func @transform_22(%arg0: i32) -> (i32, i32) {
    %c0_i32 = arith.constant 0 : i32
    %c0_i32_0 = arith.constant 0 : i32
    %c0_i32_1 = arith.constant 0 : i32
    return %c0_i32, %c0_i32_0 : i32, i32
  }
}

</mosaic_0001>

<bundles_post_ra>
// kernel: bert_classifier_forward.1
= control target key start
LH: loop header
LB: loop body
LE: loop exit
PB: predicated region body
PF: predicated region fallthrough
CT: control target
= control target key end

     0   :  { %s4496_s0 = inlined_call_operand.vmem [shape: s32[16,1], index: 0, kind: input, shape index: {}]   ;;  %s4497_s1 = inlined_call_operand.vmem [shape: f32[16,16], index: 1, kind: input, shape index: {}]   ;;  %s4498_s2 = inlined_call_operand.vmem [shape: f32[16,128], index: 2, kind: input, shape index: {}]   ;;  %s4499_s3 = inlined_call_operand.hbm [shape: bf16[128,128], index: 3, kind: input, shape index: {}]   ;;  %s4500_s4 = inlined_call_operand.vmem [shape: f32[1,128], index: 4, kind: input, shape index: {}]   ;;  %s4501_s5 = inlined_call_operand.vmem [shape: f32[1,128], index: 5, kind: input, shape index: {}]   ;;  %s4502_s6 = inlined_call_operand.hbm [shape: bf16[2,128,384], index: 6, kind: input, shape index: {}]   ;;  %s4503_s7 = inlined_call_operand.vmem [shape: f32[2,1,384], index: 7, kind: input, shape index: {}]   ;;  %s4504_s8 = inlined_call_operand.vmem [shape: bf16[2,128,128], index: 8, kind: input, shape index: {}]   ;;  %s4505_s9 = inlined_call_operand.vmem [shape: f32[2,1,128], index: 9, kind: input, shape index: {}]   ;;  %s4506_s10 = inlined_call_operand.vmem [shape: f32[2,1,128], index: 10, kind: input, shape index: {}]   ;;  %s4507_s11 = inlined_call_operand.vmem [shape: f32[2,1,128], index: 11, kind: input, shape index: {}]   ;;  %s4508_s12 = inlined_call_operand.hbm [shape: bf16[2,128,256], index: 12, kind: input, shape index: {}]   ;;  %s4509_s13 = inlined_call_operand.vmem [shape: f32[2,1,256], index: 13, kind: input, shape index: {}]   ;;  %s4510_s14 = inlined_call_operand.hbm [shape: bf16[2,256,128], index: 14, kind: input, shape index: {}]   ;;  %s4511_s15 = inlined_call_operand.vmem [shape: f32[2,1,128], index: 15, kind: input, shape index: {}]   ;;  %s4512_s16 = inlined_call_operand.vmem [shape: f32[2,1,128], index: 16, kind: input, shape index: {}]   ;;  %s4513_s17 = inlined_call_operand.vmem [shape: f32[2,1,128], index: 17, kind: input, shape index: {}]   ;;  %s4514_s18 = inlined_call_operand.hbm [shape: bf16[128,128], index: 18, kind: input, shape index: {}]   ;;  %s4515_s19 = inlined_call_operand.vmem [shape: f32[1,128], index: 19, kind: input, shape index: {}]   ;;  %s4516_s20 = inlined_call_operand.hbm [shape: bf16[128,128], index: 20, kind: input, shape index: {}]   ;;  %s4517_s21 = inlined_call_operand.vmem [shape: f32[1,128], index: 21, kind: input, shape index: {}]   ;;  %s4518_s22 = inlined_call_operand.vmem [shape: f32[2,128], index: 22, kind: output, shape index: {}]  }
   0x1   :  { %4540 = sst [smem:[#allocation21_spill]] %s4496_s0 }
   0x2   :  { %4541 = sst [smem:[#allocation22_spill]] %s4497_s1 }
   0x3   :  { %4542 = sst [smem:[#allocation23_spill]] %s4498_s2 }
   0x4   :  { %4543 = sst [smem:[#allocation24_spill]] %s4499_s3 }
   0x5   :  { %4544 = sst [smem:[#allocation25_spill]] %s4500_s4 }
   0x6   :  { %4545 = sst [smem:[#allocation26_spill]] %s4501_s5 }
   0x7   :  { %4546 = sst [smem:[#allocation27_spill]] %s4502_s6 }
   0x8   :  { %4547 = sst [smem:[#allocation28_spill]] %s4503_s7 }
   0x9   :  { %4548 = sst [smem:[#allocation29_spill]] %s4504_s8 }
   0xa   :  { %4549 = sst [smem:[#allocation30_spill]] %s4508_s12 }
   0xb   :  { %4550 = sst [smem:[#allocation31_spill]] %s4510_s14 }
   0xc   :  { %4551 = sst [smem:[#allocation32_spill]] %s4511_s15 }
   0xd   :  { %4552 = sst [smem:[#allocation33_spill]] %s4512_s16 }
   0xe   :  { %4553 = sst [smem:[#allocation34_spill]] %s4513_s17 }
   0xf   :  { %4554 = sst [smem:[#allocation35_spill]] %s4514_s18 }
  0x10   :  { %4555 = sst [smem:[#allocation36_spill]] %s4515_s19 }
  0x11   :  { %4556 = sst [smem:[#allocation37_spill]] %s4516_s20 }
  0x12   :  { %4557 = sst [smem:[#allocation38_spill]] %s4517_s21 }
  0x13   :  { %4558 = sst [smem:[#allocation39_spill]] %s4518_s22 }
  0x14   :  { %27 = vsyncpa [#allocation4], 0 }
  0x15   :  { %28 = vsyncpa [#allocation6], 0 }
  0x16   :  { %30 = vsyncpa [#allocation6 + $0x1], 0 }
  0x17   :  { %31 = vsyncpa [#allocation9], 0 }
  0x18   :  { %33 = vsyncpa [#allocation9 + $0x1], 0 }
  0x19   :  { %34 = vsyncpa [#allocation12], 0  ;;  %s3939_s3 = smov 0   ;;  %s3941_s28 = smov 0  }
  0x1a   :  { %s3943_s29 = smov 0   ;;  %s3945_s30 = smov 0  }
  0x1b LB: > { %4559 = sst [smem:[#allocation18_spill]] %s3794_s29  ;;  %s3958_s4 = sadd.s32 4294967295, %s3798_s30   ;;  %s3798_s30 = sphi %s3945_s30, %s4607_s30   ;;  %s3794_s29 = sphi %s3943_s29, %s4609_s29   ;;  %s3790_s28 = sphi %s3941_s28, %s4611_s28   ;;  %s3786_s3 = sphi %s3939_s3, %s4610_s3  }
  0x1c   : > { %p186_p0 = scmp.ne.s32.totalorder %s3790_s28, %s3786_s3  ;;  %p4532_p1 = scmp.eq.s32.totalorder %s3958_s4, 0 }
  0x1d   : > { %p2933_p2 = scmp.ge.s32.totalorder %s3798_s30, 1  ;;  %p588_p3 = scmp.lt.s32.totalorder %s3798_s30, 3 }
  0x1e   : > { %p3967_p5 = por %p4532_p1, %p186_p0  ;;  %s3800_s1 = smov [#allocation10]  }
  0x1f   : > { %p3971_p6 = pnand %p2933_p2, %p588_p3  ;;  %s628_s5 = sshll.u32 %s3800_s1, 4  ;;  %s629_s5 = int_to_ptr.vmem [resolvable:$true] %s628_s5 }
  0x20   : > { %s4560_s0 = scalar_select %p3967_p5, 1, 0 }
  0x21   : > { %s4561_s23 = scalar_select %p3971_p6, 1, 0 }
  0x22   : > { %p3322_p7 = pneg %p3971_p6  ;;  %s3984_s6 = sadd.s32 1, %s3798_s30  }
  0x23   : > { %4563 = sst [smem:[#allocation19_spill]] %s3984_s6  ;;  %s173_s25 = sadd.s32 1, %s3794_s29 }
  0x24   : > { %p3979_p8 = pnand %p3322_p7, %p4532_p1  ;;  %s170_s26 = ssub.s32 %s3798_s30, %s3984_s6 }
  0x25   : > { %s3597_s2 = scalar_lea.vmem %s629_s5, 1024  ;;  %p3605_p13 = scmp.lt.s32.totalorder %s629_s5, %s629_s5 }
  0x26   : > { %s4562_s24 = scalar_select %p3979_p8, 1, 0 }
  0x27   : > { %p4533_p9 = pneg %p3979_p8  ;;  %p3598_p10 = scmp.ne.s32.totalorder %s629_s5, %s3597_s2 }
  0x28   : > { %p3606_p0 = scmp.lt.s32.totalorder %s3597_s2, %s3597_s2 }
  0x29   : > { %p3600_p11 = pnand %p3598_p10, %p4533_p9 }
  0x2a   : > { %p3607_p2 = por %p3606_p0, %p3605_p13 }
  0x2b   : > { %p3601_p12 = pneg %p3600_p11 }
  0x2d   : > { %p3608_p3 = pnand %p3607_p2, %p3601_p12 }
  0x2f   : > { %3611 = shalt.err (!%p3608_p3)
}
  0x30   : > { %s4526_s27 = smov 64   ;;  %s4528_s3 = smov 4  }
  0x31   : > { %s4564_s18 = sld [smem:[#allocation35_spill]]  ;;  %p171_p7 = scmp.eq.s32.totalorder %s170_s26, 0 }
  0x32   : > { %p180_p10 = scmp.ne.s32.totalorder %s3794_s29, %s3790_s28  ;;  %p181_p11 = scmp.eq.s32.totalorder %s3798_s30, 0 }
  0x33   : > { %p3345_p12 = scmp.lt.s32.totalorder %s3798_s30, 2  ;;  %s4531_s22 = sand.u32 1, %s3798_s30  }
  0x34   : > { %s4007_s6 = scalar_select %p171_p7, %s3794_s29, %s173_s25  }
  0x35   : > { %p182_p13 = por %p181_p11, %p180_p10  ;;  %s4530_s21 = sand.u32 1, %s3794_s29  }
  0x36   : > { %4565 = sst [smem:[#allocation20_spill]] %s4007_s6  ;;  %s3300_s19 = smul.u32 192, %s4530_s21 }
  0x37   : > { %3328 = dma.hbm_to_vmem [thread:$0]  (!%p3979_p8), %s4564_s18, 1024, %s629_s5, [#allocation9], %s4526_s27, %s4526_s27, %s4528_s3  }
  0x38   : > { %p4013_p0 = pnand %p3345_p12, %p182_p13  ;;  %s3301_s16 = smul.u32 3072, %s3798_s30 }
  0x39   : > { %s4567_s2 = sld [smem:[#allocation27_spill]]  ;;  %s665_s25 = scalar_lea.vmem [#allocation5], %s3300_s19 }
  0x3a   : > { %s672_s27 = sshll.u32 %s665_s25, 4  ;;  %s4027_s3 = scalar_lea.sflag [#allocation6], %s4531_s22  ;;  %s4023_s27 = int_to_ptr.vmem [resolvable:$true] %s672_s27 }
  0x3b   : > { %p4033_p3 = pneg %p4013_p0 }
  0x3f   : > { %s4021_s26 = scalar_lea.hbm %s4567_s2, %s3301_s16  ;;  %s3617_s19 = scalar_lea.hbm %s4567_s2, 6144 }
  0x40   : > { %s3612_s21 = scalar_lea.hbm %s4021_s26, 3072  ;;  %p3618_p11 = scmp.lt.s32.totalorder %s4021_s26, %s4567_s2 }
  0x41   : > { %p3613_p2 = scmp.ne.s32.totalorder %s4021_s26, %s3612_s21  ;;  %p3619_p12 = scmp.lt.s32.totalorder %s3617_s19, %s3612_s21 }
  0x43   : > { %p3615_p7 = pnand %p4033_p3, %p3613_p2  ;;  %p3620_p13 = por %p3619_p12, %p3618_p11 }
  0x45   : > { %p3616_p10 = pneg %p3615_p7 }
  0x47   : > { %p3621_p4 = pnand %p3620_p13, %p3616_p10 }
  0x49   : > { %3624 = shalt.err (!%p3621_p4)
}
  0x4a   : > { %s3625_s22 = scalar_lea.vmem %s4023_s27, 3072  ;;  %s3803_s6 = smov [#allocation5]  }
  0x4b   : > { %p3626_p1 = scmp.ne.s32.totalorder %s4023_s27, %s3625_s22  ;;  %s3630_s16 = sshll.u32 %s3803_s6, 4  ;;  %s3631_s16 = int_to_ptr.vmem [resolvable:$false] %s3630_s16 }
  0x4c   : > { %s3632_s1 = scalar_lea.vmem %s3631_s16, 6144  ;;  %p3633_p9 = scmp.lt.s32.totalorder %s4023_s27, %s3631_s16 }
  0x4d   : > { %p3628_p2 = pnand %p3626_p1, %p4033_p3  ;;  %p3634_p5 = scmp.lt.s32.totalorder %s3632_s1, %s3625_s22 }
  0x4f   : > { %p3629_p7 = pneg %p3628_p2  ;;  %p3635_p6 = por %p3634_p5, %p3633_p9 }
  0x51   : > { %p3636_p8 = pnand %p3635_p6, %p3629_p7 }
  0x53   : > { %3639 = shalt.err (!%p3636_p8)
}
  0x54   : > { %s3804_s21 = smov 192   ;;  %s3805_s19 = smov 12  }
  0x55   : > { %3335 = dma.hbm_to_vmem [thread:$0]  (!%p4013_p0), %s4021_s26, 3072, %s4023_s27, %s4027_s3, %s3804_s21, %s3804_s21, %s3805_s19  }
  0x56   : > { %s4569_s5 = sand.u32 1, %s3794_s29   ;;  %s3806_s6 = smov [#allocation3]  }
  0x57   : > { %s4058_s25 = sshll.u32 %s4569_s5, 7  ;;  %s609_s2 = sshll.u32 %s3806_s6, 4  ;;  %s610_s2 = int_to_ptr.vmem [resolvable:$true] %s609_s2 }
  0x58   : > { %s3807_s16 = smov [#allocation11]   ;;  %s3651_s1 = scalar_lea.vmem %s610_s2, 1024 }
  0x59   : > { %s644_s22 = sshll.u32 %s3807_s16, 4  ;;  %p3652_p1 = scmp.ne.s32.totalorder %s610_s2, %s3651_s1  ;;  %s645_s22 = int_to_ptr.vmem [resolvable:$true] %s644_s22 }
  0x5a   : > { %p4570_p4 = scmp.ne.s32.totalorder %s4562_s24, 0  ;;  %p3659_p9 = scmp.lt.s32.totalorder %s610_s2, %s610_s2 }
  0x5b   : > { %p3660_p10 = scmp.lt.s32.totalorder %s3651_s1, %s3651_s1 }
  0x5c   : > { %p4571_p5 = pneg %p4570_p4 }
  0x5d   : > { %p3661_p11 = por %p3660_p10, %p3659_p9 }
  0x5e   : > { %p3654_p6 = pnand %p3652_p1, %p4571_p5 }
  0x60   : > { %p3655_p8 = pneg %p3654_p6 }
  0x62   : > { %p3662_p12 = pnand %p3661_p11, %p3655_p8 }
  0x64   : > { %3665 = shalt.err (!%p3662_p12)
}
  0x65   : > { %s4572_s27 = smov 4   ;;  %s4573_s26 = smov 64  }
  0x66   : > { %s4574_s5 = sld [smem:[#allocation24_spill]]  ;;  %s3677_s6 = scalar_lea.vmem %s645_s22, 1024 }
  0x67   : > { %p3678_p13 = scmp.ne.s32.totalorder %s645_s22, %s3677_s6  ;;  %p4575_p2 = pmov %p4571_p5 }
  0x68   : > { %p3685_p5 = scmp.lt.s32.totalorder %s645_s22, %s645_s22  ;;  %p3686_p6 = scmp.lt.s32.totalorder %s3677_s6, %s3677_s6 }
  0x69   : > { %p3680_p7 = pnand %p3678_p13, %p4575_p2 }
  0x6a   : > { %p3687_p8 = por %p3686_p6, %p3685_p5 }
  0x6b   : > { %p3681_p1 = pneg %p3680_p7 }
  0x6c   : > { %3325 = dma.hbm_to_vmem [thread:$0]  (!%p4570_p4), %s4574_s5, 1024, %s610_s2, [#allocation4], %s4573_s26, %s4573_s26, %s4572_s27  }
  0x6d   : > { %p3688_p9 = pnand %p3687_p8, %p3681_p1 }
  0x6f   : > { %3691 = shalt.err (!%p3688_p9)
}
  0x70   : > { %s4576_s20 = sld [smem:[#allocation37_spill]]  ;;  %s3066_s2 = sshll.u32 %s3798_s30, 11 }
  0x71   : > { %s4577_s12 = sld [smem:[#allocation30_spill]]  ;;  %s719_s24 = scalar_lea.vmem [#allocation7], %s4058_s25 }
  0x72   : > { %s726_s6 = sshll.u32 %s719_s24, 4  ;;  %s4091_s6 = int_to_ptr.vmem [resolvable:$true] %s726_s6 }
  0x76   : > { %3331 = dma.hbm_to_vmem [thread:$0]  (!%p4570_p4), %s4576_s20, 1024, %s645_s22, [#allocation12], %s4573_s26, %s4573_s26, %s4572_s27  }
  0x77   : > { %s4088_s5 = scalar_lea.hbm %s4577_s12, %s3066_s2  ;;  %s3697_s20 = scalar_lea.hbm %s4577_s12, 4096 }
  0x78   : > { %s3692_s16 = scalar_lea.hbm %s4088_s5, 2048  ;;  %p3698_p4 = scmp.lt.s32.totalorder %s4088_s5, %s4577_s12 }
  0x79   : > { %p3693_p10 = scmp.ne.s32.totalorder %s4088_s5, %s3692_s16  ;;  %p3699_p13 = scmp.lt.s32.totalorder %s3697_s20, %s3692_s16 }
  0x7b   : > { %p3695_p11 = pnand %p3693_p10, %p4033_p3  ;;  %p3700_p2 = por %p3699_p13, %p3698_p4 }
  0x7d   : > { %p3696_p12 = pneg %p3695_p11 }
  0x7f   : > { %p3701_p7 = pnand %p3700_p2, %p3696_p12 }
  0x81   : > { %3704 = shalt.err (!%p3701_p7)
}
  0x82   : > { %s3705_s19 = scalar_lea.vmem %s4091_s6, 2048  ;;  %s3808_s24 = smov [#allocation7]  }
  0x83   : > { %p3706_p1 = scmp.ne.s32.totalorder %s4091_s6, %s3705_s19  ;;  %s3710_s22 = sshll.u32 %s3808_s24, 4  ;;  %s3711_s22 = int_to_ptr.vmem [resolvable:$false] %s3710_s22 }
  0x84   : > { %s3712_s1 = scalar_lea.vmem %s3711_s22, 4096  ;;  %p3713_p8 = scmp.lt.s32.totalorder %s4091_s6, %s3711_s22 }
  0x85   : > { %p3708_p5 = pnand %p3706_p1, %p4033_p3  ;;  %p3714_p9 = scmp.lt.s32.totalorder %s3712_s1, %s3705_s19 }
  0x87   : > { %p3709_p6 = pneg %p3708_p5  ;;  %p3715_p10 = por %p3714_p9, %p3713_p8 }
  0x89   : > { %p3716_p11 = pnand %p3715_p10, %p3709_p6 }
  0x8b   : > { %3719 = shalt.err (!%p3716_p11)
}
  0x8c   : > { %s3809_s20 = smov 128   ;;  %s3810_s29 = smov 8  }
  0x8d   : > { %3338 = dma.hbm_to_vmem [thread:$0]  (!%p4013_p0), %s4088_s5, 2048, %s4091_s6, %s4027_s3, %s3809_s20, %s3809_s20, %s3810_s29  }
  0x8e   : > { %s4578_s14 = sld [smem:[#allocation31_spill]]  ;;  %s747_s24 = scalar_lea.vmem [#allocation8], %s4058_s25 }
  0x8f   : > { %s754_s22 = sshll.u32 %s747_s24, 4  ;;  %s4579_s1 = sand.u32 1, %s3798_s30   ;;  %s4122_s22 = int_to_ptr.vmem [resolvable:$true] %s754_s22 }
  0x90   : > { %s744_s12 = scalar_lea.sflag [#allocation9], %s4579_s1 }
  0x94   : > { %s4119_s19 = scalar_lea.hbm %s4578_s14, %s3066_s2  ;;  %s3725_s6 = scalar_lea.hbm %s4578_s14, 4096 }
  0x95   : > { %s3720_s15 = scalar_lea.hbm %s4119_s19, 2048  ;;  %p3726_p2 = scmp.lt.s32.totalorder %s4119_s19, %s4578_s14 }
  0x96   : > { %p3721_p12 = scmp.ne.s32.totalorder %s4119_s19, %s3720_s15  ;;  %p3727_p7 = scmp.lt.s32.totalorder %s3725_s6, %s3720_s15 }
  0x98   : > { %p3723_p4 = pnand %p3721_p12, %p4033_p3  ;;  %p3728_p1 = por %p3727_p7, %p3726_p2 }
  0x9a   : > { %p3724_p13 = pneg %p3723_p4 }
  0x9c   : > { %p3729_p5 = pnand %p3728_p1, %p3724_p13 }
  0x9e   : > { %3732 = shalt.err (!%p3729_p5)
}
  0x9f   : > { %s3733_s30 = scalar_lea.vmem %s4122_s22, 2048  ;;  %s3811_s25 = smov [#allocation8]  }
  0xa0   : > { %p3734_p6 = scmp.ne.s32.totalorder %s4122_s22, %s3733_s30  ;;  %s3738_s29 = sshll.u32 %s3811_s25, 4  ;;  %s3739_s29 = int_to_ptr.vmem [resolvable:$false] %s3738_s29 }
  0xa1   : > { %s3740_s16 = scalar_lea.vmem %s3739_s29, 4096  ;;  %p3741_p10 = scmp.lt.s32.totalorder %s4122_s22, %s3739_s29 }
  0xa2   : > { %p3736_p8 = pnand %p3734_p6, %p4033_p3  ;;  %p3742_p11 = scmp.lt.s32.totalorder %s3740_s16, %s3733_s30 }
  0xa4   : > { %p3737_p9 = pneg %p3736_p8  ;;  %p3743_p12 = por %p3742_p11, %p3741_p10 }
  0xa6   : > { %p3744_p4 = pnand %p3743_p12, %p3737_p9 }
  0xa8   : > { %3747 = shalt.err (!%p3744_p4)
}
  0xa9   : > { %3341 = dma.hbm_to_vmem [thread:$0]  (!%p4013_p0), %s4119_s19, 2048, %s4122_s22, %s744_s12, %s4573_s26, %s4573_s26, %s4572_s27  }
  0xaa   : > { %p4580_p3 = scmp.ne.s32.totalorder %s4561_s23, 0 }
  0xab   : > { %p4581_p13 = scmp.eq.s32.totalorder (!%p4580_p3), %s3958_s4, 0 }
  0xac   : > { %784 = sbr.rel (%p4580_p3) target bundleno = 3790 (0xece), region = 108 }
  0xb1   : > { %3765 = dma.done.wait (%p4581_p13), [#allocation4], 1024   ;;  %p4582_p2 = pmov %p4581_p13 }
  0xb2   : > { %s790_s15 = sand.u32 1, %s3958_s4   ;;  %s792_s17 = sand.u32 1, %s3790_s28  }
  0xb3   : > { %3767 = vsyncadd (%p4582_p2), [#allocation4], 4294966272  ;;  %s3302_s18 = smul.u32 192, %s792_s17  ;;  %s791_s21 = scalar_lea.sflag [#allocation6], %s790_s15 }
  0xb4   : > { %p4583_p7 = scmp.ne.s32.totalorder %s4560_s0, 0 }
  0xb5   : > { %s4157_s24 = scalar_lea.vmem [#allocation5], %s3302_s18 }
  0xb6   : > { %3769 = dma.done.wait (%p4583_p7), %s791_s21, 5120  }
  0xb7   : > { %3771 = vsyncadd (%p4583_p7), %s791_s21, 4294962176  ;;  %s2947_s12 = sshll.u32 %s792_s17, 7  ;;  %s809_s27 = scalar_lea.sflag [#allocation9], %s790_s15 }
  0xb8   : > { %s4163_s23 = scalar_lea.vmem [#allocation7], %s2947_s12  ;;  %s4165_s26 = scalar_lea.vmem [#allocation8], %s2947_s12 }
  0xb9   : > { %3773 = dma.done.wait (%p4583_p7), %s809_s27, 2048  }
  0xba   : > { %3775 = vsyncadd (%p4583_p7), %s809_s27, 4294965248  ;;  %p4584_p0 = pmov %p4582_p2 }
  0xbc   : > { %3777 = dma.done.wait (%p4584_p0), [#allocation9], 1024   ;;  %p4585_p1 = pmov %p4584_p0 }
  0xbd   : > { %p4586_p5 = pmov %p4584_p0 }
  0xbe   : > { %3779 = vsyncadd (%p4585_p1), [#allocation9], 4294966272 }
  0xbf   : > { %3781 = dma.done.wait (%p4586_p5), [#allocation12], 1024   ;;  %p4587_p6 = pmov %p4584_p0 }
  0xc0   : > { %p917_p8 = scmp.lt.s32.totalorder %s3958_s4, 1  ;;  %s4588_s8 = sld [smem:[#allocation29_spill]] }
  0xc1   : > { %3783 = vsyncadd (%p4587_p6), [#allocation12], 4294966272  ;;  %s4589_s7 = sld [smem:[#allocation28_spill]]  ;;  %p4593_p9 = scmp.ne.s32.totalorder %s3958_s4, 0 }
  0xc2   : > { %s4181_s19 = scalar_select %p917_p8, %s3958_s4, 1 }
  0xc3   : > { %s4590_s20 = sld [smem:[#allocation32_spill]] }
  0xc4   : > { %s3303_s0 = smul.u32 3, %s4181_s19  ;;  %s3068_s22 = sshll.u32 %s4181_s19, 6 }
  0xc5   : > { %s934_s12 = scalar_lea.vmem %s4507_s11, %s4181_s19  ;;  %s2953_s27 = sshll.u32 %s4181_s19, 1 }
  0xc6   : > { %s4188_s5 = scalar_lea.vmem %s4588_s8, %s3068_s22  ;;  %s4211_s3 = scalar_lea.vmem %s4509_s13, %s2953_s27 }
  0xc7   : > { %s4197_s29 = scalar_lea.vmem %s4589_s7, %s3303_s0  ;;  %s4591_s7 = sld [smem:[#allocation33_spill]] }
  0xc8   : > { %s4592_s17 = sld [smem:[#allocation34_spill]] }
  0xc9   : > { %s941_s30 = scalar_lea.vmem %s4590_s20, %s4181_s19  ;;  %s4594_s22 = sld [smem:[#allocation21_spill]] (!%p4593_p9) }
  0xca   : > { %952 = sbr.rel (%p4593_p9) target bundleno = 845 (0x34d), region = 136  ;;  %s4595_s1 = sld [smem:[#allocation23_spill]] (!%p4593_p9) }
  0xcb   : > { %s4596_s16 = sld [smem:[#allocation25_spill]] (!%p4593_p9) }
  0xcc   : > { %s4597_s21 = sld [smem:[#allocation26_spill]] (!%p4593_p9) }
  0xcd   : > { %s944_s8 = scalar_lea.vmem %s4591_s7, %s4181_s19 }
  0xce   : > { %s947_s14 = scalar_lea.vmem %s4592_s17, %s4181_s19 }
  0xcf   : > { %v953_v0 = vld [vmem:[%s4594_s22] sm:$0xff]  ;;  %v3812_v1 = vmov 0   ;;  %v3813_v2 = vmov 0.0   ;;  %v3403_v3 = vld [vmem:[#allocation3 + $0x38] sm:$0xff]   ;;  %vm3814_vm0 = vmmov 0   ;;  %v3405_v6 = vld [vmem:[#allocation3 + $0x28] sm:$0xff]   ;;  %v955_v12 = vlaneseq }
  0xd0   : > { %3402 = vset.pattern.permute.xlu0 %v3812_v1  ;;  %3152 = vmatprep.subr.bf16.mxu0 %v3813_v2  ;;  %v954_v4 = vld [vmem:[%s4594_s22 + $0x8] sm:$0xff]  ;;  %v3404_v5 = vld [vmem:[#allocation3 + $0x30] sm:$0xff]   ;;  %v3406_v7 = vld [vmem:[#allocation3 + $0x20] sm:$0xff]   ;;  %v3815_v16 = vmov 1.0|1.0  }
  0xd1   : > { %958 = vperm.xlu0 %3402, %v953_v0   ;;  %3153 = vmatpush3.bf16.msra.mxu0 %v3403_v3  ;;  %v3407_v8 = vld [vmem:[#allocation3 + $0x18] sm:$0xff]   ;;  %v3408_v9 = vld [vmem:[#allocation3 + $0x10] sm:$0xff]   ;;  %v3409_v10 = vld [vmem:[#allocation3 + $0x8] sm:$0xff]   ;;  %v956_v14 = vand.u32 127, %v955_v12 }
  0xd2   : > { %3154 = vmatprep.subr.bf16.mxu0 %v3813_v2  ;;  %3168 = vmatprep.mubr.msk.bf16.mxu0 %vm3814_vm0, %v3813_v2  ;;  %v3410_v11 = vld [vmem:[#allocation3] sm:$0xff]   ;;  %v984_v17 = vld [vmem:[%s4595_s1] sm:$0xff]  ;;  %v985_v21 = vld [vmem:[%s4595_s1 + $0x8] sm:$0xff] }
  0xd3   : > { %v2965_v40 = vld [vmem:[%s4596_s16] ss:$0 sm:$0xff] }
  0xd4   : > { %v2966_v42 = vld [vmem:[%s4597_s21] ss:$0 sm:$0xff] }
  0xd5   : > { %961 = vperm.xlu0 %3402, %v954_v4   ;;  %3155 = vmatpush3.bf16.msra.mxu0 %v3404_v5 }
  0xd6   : > { %3156 = vmatprep.subr.bf16.mxu0 %v3813_v2 }
  0xd9   : > { %3157 = vmatpush3.bf16.msra.mxu0 %v3405_v6 }
  0xda   : > { %3158 = vmatprep.subr.bf16.mxu0 %v3813_v2 }
  0xdd   : > { %3159 = vmatpush3.bf16.msra.mxu0 %v3406_v7 }
  0xde   : > { %3160 = vmatprep.subr.bf16.mxu0 %v3813_v2 }
  0xe1   : > { %3161 = vmatpush3.bf16.msra.mxu0 %v3407_v8 }
  0xe2   : > { %3162 = vmatprep.subr.bf16.mxu0 %v3813_v2 }
  0xe5   : > { %3163 = vmatpush3.bf16.msra.mxu0 %v3408_v9 }
  0xe6   : > { %3164 = vmatprep.subr.bf16.mxu0 %v3813_v2 }
  0xe9   : > { %3165 = vmatpush3.bf16.msra.mxu0 %v3409_v10 }
  0xea   : > { %3166 = vmatprep.subr.bf16.mxu0 %v3813_v2 }
  0xed   : > { %3167 = vmatpush3.bf16.msra.mxu0 %v3410_v11 }
 0x14c   : > { %v959_v13 = vpop.permute.xlu0 %958 }
 0x14d   : > { %vm963_vm1 = vcmp.eq.s32.totalorder %v956_v14, %v959_v13 }
 0x150   : > { %v962_v15 = vpop.permute.xlu0 %961 }
 0x151   : > { %vm964_vm2 = vcmp.eq.s32.totalorder %v956_v14, %v962_v15 }
 0x152   : > { %vm2963_vm3 = vmpackc.low %vm964_vm2, %vm963_vm1 }
 0x153   : > { %3169 = vmatmul.mubr.msk.bf16.vlgmr.msra.gmra.mxu0 %vm2963_vm3, %v3815_v16 }
 0x213   : > { %v1068_v18 = vpop.f32.mrf.mxu0 }
 0x214   : > { %v1069_v19 = vadd.f32 %v1068_v18, %v984_v17 }
 0x215   : > { %v3170_v20 = vpop.f32.mrf.mxu0 }
 0x216   : > { %1077 = vadd.xlane.f32.xlu1 %v1069_v19 }
 0x217   : > { %v1071_v22 = vpop.f32.mrf.mxu0 }
 0x218   : > { %v1072_v23 = vadd.f32 %v1071_v22, %v985_v21 }
 0x219   : > { %v3171_v24 = vpop.f32.mrf.mxu0 }
 0x21a   : > { %1079 = vadd.xlane.f32.xlu1 %v1072_v23 }
 0x29f   : > { %v1078_v25 = vpop.xlane.xlu1 %1077 }
 0x2a0   : > { %v1082_v26 = vmul.f32 0.0078125, %v1078_v25 }
 0x2a2   : > { %v1084_v27 = vsub.f32 %v1069_v19, %v1082_v26 }
 0x2a3   : > { %v1080_v28 = vpop.xlane.xlu1 %1079 }
 0x2a4   : > { %v1083_v29 = vmul.f32 0.0078125, %v1080_v28  ;;  %v1086_v30 = vmul.f32 %v1084_v27, %v1084_v27 }
 0x2a6   : > { %v1085_v31 = vsub.f32 %v1072_v23, %v1083_v29  ;;  %1088 = vadd.xlane.f32.xlu0 %v1086_v30 }
 0x2a8   : > { %v1087_v32 = vmul.f32 %v1085_v31, %v1085_v31 }
 0x2aa   : > { %1090 = vadd.xlane.f32.xlu1 %v1087_v32 }
 0x32f   : > { %v1089_v33 = vpop.xlane.xlu0 %1088 }
 0x330   : > { %v1092_v34 = vmul.f32 0.0078125, %v1089_v33 }
 0x332   : > { %v1094_v35 = vadd.f32 1e-12, %v1092_v34 }
 0x333   : > { %v1091_v36 = vpop.xlane.xlu1 %1090 }
 0x334   : > { %3411 = vrsqrt.f32 %v1094_v35  ;;  %v1093_v37 = vmul.f32 0.0078125, %v1091_v36 }
 0x336   : > { %v1095_v38 = vadd.f32 1e-12, %v1093_v37 }
 0x338   : > { %3413 = vrsqrt.f32 %v1095_v38 }
 0x341   : > { %v3412_v39 = vpop.eup %3411 }
 0x342   : > { %v1098_v41 = vmul.f32 %v3412_v39, %v1084_v27 }
 0x344   : > { %v1106_v43 = vmul.f32 %v2965_v40, %v1098_v41 }
 0x345   : > { %v3414_v44 = vpop.eup %3413 }
 0x346   : > { %v1114_v45 = vadd.f32 %v2966_v42, %v1106_v43  ;;  %v1099_v46 = vmul.f32 %v3414_v44, %v1085_v31 }
 0x348   : > { %1116 = vst [vmem:[#allocation2] sm:$0xff] %v1114_v45  ;;  %v1107_v47 = vmul.f32 %v2965_v40, %v1099_v46 }
 0x34a   : > { %v1115_v48 = vadd.f32 %v2966_v42, %v1107_v47 }
 0x34c   : > { %1117 = vst [vmem:[#allocation2 + $0x8] sm:$0xff] %v1115_v48 }
 0x34d PF: > { %v3430_v49 = vld [vmem:[%s4157_s24 + $0xac] ss:$12 sps:$4 sm:$0xff]   ;;  %v3432_v50 = vld [vmem:[%s4157_s24 + $0xa8] ss:$12 sps:$4 sm:$0xff]   ;;  %v3816_v51 = vmov 0   ;;  %v3817_v52 = vmov 0.0   ;;  %v1157_v14 = vlaneseq  ;;  %s4599_s25 = scalar_lea.vmem %s4505_s9, %s4181_s19 }
 0x34e   : > { %1332 = vmatprep.mubr.bf16.mxu0 %v3816_v51  ;;  %3172 = vmatprep.subr.bf16.mxu1 %v3817_v52  ;;  %v3433_v53 = vld [vmem:[%s4157_s24 + $0x94] ss:$12 sps:$4 sm:$0xff]   ;;  %v3435_v54 = vld [vmem:[%s4157_s24 + $0x90] ss:$12 sps:$4 sm:$0xff]   ;;  %v3438_v56 = vld [vmem:[%s4157_s24 + $0x78] ss:$12 sps:$4 sm:$0xff]  }
 0x34f   : > { %1300 = vmatprep.subr.bf16.mxu0 %v3430_v49  ;;  %v3436_v55 = vld [vmem:[%s4157_s24 + $0x7c] ss:$12 sps:$4 sm:$0xff]   ;;  %v3439_v57 = vld [vmem:[%s4157_s24 + $0x64] ss:$12 sps:$4 sm:$0xff]   ;;  %v3441_v58 = vld [vmem:[%s4157_s24 + $0x60] ss:$12 sps:$4 sm:$0xff]  }
 0x350   : > { %1301 = vmatpush1.bf16.msra.mxu0 %v3432_v50  ;;  %v3442_v59 = vld [vmem:[%s4157_s24 + $0x4c] ss:$12 sps:$4 sm:$0xff]   ;;  %v3454_v60 = vld [vmem:[%s4157_s24 + $0xb0] ss:$12 sps:$4 sm:$0xff]   ;;  %v3444_v62 = vld [vmem:[%s4157_s24 + $0x48] ss:$12 sps:$4 sm:$0xff]  }
 0x351   : > { %1302 = vmatprep.subr.bf16.mxu0 %v3433_v53  ;;  %3173 = vmatpush3.bf16.msra.mxu1 %v3454_v60  ;;  %v3455_v61 = vld [vmem:[%s4157_s24 + $0x98] ss:$12 sps:$4 sm:$0xff]   ;;  %v3445_v63 = vld [vmem:[%s4157_s24 + $0x34] ss:$12 sps:$4 sm:$0xff]   ;;  %v3447_v1 = vld [vmem:[%s4157_s24 + $0x30] ss:$12 sps:$4 sm:$0xff]  }
 0x352   : > { %3174 = vmatprep.subr.bf16.mxu1 %v3817_v52  ;;  %v3456_v0 = vld [vmem:[%s4157_s24 + $0x80] ss:$12 sps:$4 sm:$0xff]   ;;  %v3448_v2 = vld [vmem:[%s4157_s24 + $0x1c] ss:$12 sps:$4 sm:$0xff]   ;;  %v3450_v4 = vld [vmem:[%s4157_s24 + $0x18] ss:$12 sps:$4 sm:$0xff]  }
 0x353   : > { %v3457_v3 = vld [vmem:[%s4157_s24 + $0x68] ss:$12 sps:$4 sm:$0xff]   ;;  %v3451_v5 = vld [vmem:[%s4157_s24 + $0x4] ss:$12 sps:$4 sm:$0xff]   ;;  %v3453_v7 = vld [vmem:[%s4157_s24] ss:$12 sps:$4 sm:$0xff]  }
 0x354   : > { %1303 = vmatpush1.bf16.msra.mxu0 %v3435_v54  ;;  %v3458_v6 = vld [vmem:[%s4157_s24 + $0x50] ss:$12 sps:$4 sm:$0xff]   ;;  %v3459_v11 = vld [vmem:[%s4157_s24 + $0x38] ss:$12 sps:$4 sm:$0xff]   ;;  %v3460_v12 = vld [vmem:[%s4157_s24 + $0x20] ss:$12 sps:$4 sm:$0xff]  }
 0x355   : > { %1304 = vmatprep.subr.bf16.mxu0 %v3436_v55  ;;  %3175 = vmatpush3.bf16.msra.mxu1 %v3455_v61  ;;  %v4271_v8 = vld [vmem:[#allocation2] sm:$0xff]  ;;  %v4273_v9 = vld [vmem:[#allocation2 + $0x8] sm:$0xff]  ;;  %vm3818_vm4 = vmmov 0   ;;  %v4292_v15 = vshrl.u32 %v1157_v14, 7  ;;  %vm1386_vm5 = vcmask 261120   ;;  %s3821_s20 = smov 32  }
 0x356   : > { %3176 = vmatprep.subr.bf16.mxu1 %v3817_v52  ;;  %v1122_v10 = vpack.c.bf16 %v4273_v9, %v4271_v8  ;;  %v3461_v13 = vld [vmem:[%s4157_s24 + $0x8] ss:$12 sps:$4 sm:$0xff]   ;;  %3188 = vmatprep.mubr.msk.bf16.mxu1 %vm3818_vm4, %v3817_v52  ;;  %v1155_v18 = vld [vmem:[%s4197_s29] sm:$0x7]  ;;  %s3819_s24 = smov 64   ;;  %s3820_s29 = smov 96  }
 0x357   : > { %v1163_v16 = vsub.s32 1, %v4292_v15  ;;  %v1159_v20 = vsub.s32 0, %v4292_v15  ;;  %v1167_v32 = vsub.s32 2, %v4292_v15  ;;  %s4598_s17 = sld [smem:[#allocation22_spill]]  ;;  %vm1605_vm6 = vcmask 130048   ;;  %p3045_p10 = scmp.ne.s32.totalorder %s3958_s4, 1 }
 0x358   : > { %1305 = vmatpush1.bf16.msra.mxu0 %v3438_v56  ;;  %vm1911_vm7 = vcmask 523264   ;;  %vm1914_vm8 = vcmask 785408   ;;  %s4604_s4 = sld [smem:[#allocation36_spill]] (!%p3045_p10) }
 0x359   : > { %1306 = vmatprep.subr.bf16.mxu0 %v3439_v57  ;;  %3177 = vmatpush3.bf16.msra.mxu1 %v3456_v0  ;;  %v1164_v21 = vrot.slane %v1155_v18, %v1163_v16  ;;  %v1160_v24 = vrot.slane %v1155_v18, %v1159_v20  ;;  %v1168_v33 = vrot.slane %v1155_v18, %v1167_v32  ;;  %s4605_s2 = sld [smem:[#allocation38_spill]] (!%p3045_p10) }
 0x35a   : > { %3178 = vmatprep.subr.bf16.mxu1 %v3817_v52 }
 0x35c   : > { %1307 = vmatpush1.bf16.msra.mxu0 %v3441_v58 }
 0x35d   : > { %1308 = vmatprep.subr.bf16.mxu0 %v3442_v59  ;;  %3179 = vmatpush3.bf16.msra.mxu1 %v3457_v3  ;;  %v1120_v53 = vld [vmem:[%s4598_s17] sm:$0xff]  ;;  %v1121_v58 = vld [vmem:[%s4598_s17 + $0x8] sm:$0xff] }
 0x35e   : > { %3180 = vmatprep.subr.bf16.mxu1 %v3817_v52 }
 0x360   : > { %1309 = vmatpush1.bf16.msra.mxu0 %v3444_v62 }
 0x361   : > { %1310 = vmatprep.subr.bf16.mxu0 %v3445_v63  ;;  %3181 = vmatpush3.bf16.msra.mxu1 %v3458_v6 }
 0x362   : > { %3182 = vmatprep.subr.bf16.mxu1 %v3817_v52 }
 0x364   : > { %1311 = vmatpush1.bf16.msra.mxu0 %v3447_v1 }
 0x365   : > { %1312 = vmatprep.subr.bf16.mxu0 %v3448_v2  ;;  %3183 = vmatpush3.bf16.msra.mxu1 %v3459_v11 }
 0x366   : > { %3184 = vmatprep.subr.bf16.mxu1 %v3817_v52 }
 0x368   : > { %1313 = vmatpush1.bf16.msra.mxu0 %v3450_v4 }
 0x369   : > { %1314 = vmatprep.subr.bf16.mxu0 %v3451_v5  ;;  %3185 = vmatpush3.bf16.msra.mxu1 %v3460_v12 }
 0x36a   : > { %3186 = vmatprep.subr.bf16.mxu1 %v3817_v52 }
 0x36c   : > { %1315 = vmatpush1.bf16.msra.mxu0 %v3453_v7 }
 0x36d   : > { %3216 = vmatprep.subr.bf16.mxu0 %v3817_v52  ;;  %3187 = vmatpush3.bf16.msra.mxu1 %v3461_v13 }
 0x36e   : > { %3192 = vmatprep.subr.bf16.mxu1 %v3817_v52 }
 0x36f   : > { %1333 = vmatmul.mubr.bf16.vlgmr.msra.gmra.mxu0 %v1122_v10 }
 0x370   : > { %3218 = vmatprep.mubr.msk.bf16.mxu0 %vm3818_vm4, %v3817_v52  ;;  %3189 = vmatmul.mubr.bf16.vlgmr.msra.gmra.mxu1 %v1122_v10 }
 0x371   : > { %3194 = vmatprep.mubr.msk.bf16.mxu1 %vm3818_vm4, %v3817_v52 }
 0x42f   : > { %v1334_v17 = vpop.f32.mrf.mxu0 }
 0x430   : > { %v1335_v29 = vadd.f32 %v1334_v17, %v1160_v24  ;;  %v1377_v34 = vpop.f32.mrf.mxu1 }
 0x431   : > { %v1336_v19 = vpop.f32.mrf.mxu0  ;;  %v1378_v36 = vadd.f32 %v1377_v34, %v1168_v33 }
 0x432   : > { %v1337_v25 = vadd.f32 %v1336_v19, %v1164_v21  ;;  %v3190_v35 = vpop.f32.mrf.mxu1 }
 0x433   : > { %v1338_v22 = vpop.f32.mrf.mxu0 }
 0x434   : > { %v1339_v27 = vadd.f32 %v1338_v22, %v1160_v24  ;;  %v1380_v37 = vpop.f32.mrf.mxu1 }
 0x435   : > { %v1340_v23 = vpop.f32.mrf.mxu0  ;;  %v1381_v38 = vadd.f32 %v1380_v37, %v1168_v33 }
 0x436   : > { %v1341_v26 = vadd.f32 %v1340_v23, %v1164_v21  ;;  %v1384_v31 = vpack.c.bf16 %v1339_v27, %v1335_v29  ;;  %v3191_v39 = vpop.f32.mrf.mxu1 }
 0x437   : > { %v4313_v40 = vpack.c.bf16 %v1381_v38, %v1378_v36 }
 0x438   : > { %v1385_v28 = vpack.c.bf16 %v1341_v26, %v1337_v25 }
 0x439   : > { %3217 = vmatpush3.bf16.msra.mxu0 %v4313_v40 }
 0x43a   : > { %1497 = vrot.lane.b32.xlu1 %v1385_v28, %s3819_s24  ;;  %1442 = vrot.lane.b32.xlu0 %v1385_v28, %s3820_s29  ;;  %v1391_v30 = vsel %vm1386_vm5, %v1385_v28, 0 }
 0x43b   : > { %3193 = vmatpush3.bf16.xpose.msra.mxu1 %v1391_v30  ;;  %3228 = vmatprep.subr.bf16.mxu0 %v3817_v52 }
 0x43c   : > { %3198 = vmatprep.subr.bf16.mxu1 %v3817_v52 }
 0x43e   : > { %1495 = vrot.lane.b32.xlu1 %v1384_v31, %s3819_s24  ;;  %1439 = vrot.lane.b32.xlu0 %v1384_v31, %s3820_s29 }
 0x442   : > { %1550 = vrot.lane.b32.xlu1 %v1384_v31, %s3821_s20  ;;  %1552 = vrot.lane.b32.xlu0 %v1385_v28, %s3821_s20 }
 0x443   : > { %3195 = vmatmul.mubr.msk.bf16.vlgmr.msra.gmra.mxu1 %vm1386_vm5, %v1384_v31 }
 0x444   : > { %3200 = vmatprep.mubr.msk.bf16.mxu1 %vm3818_vm4, %v3817_v52 }
 0x4ac   : > { %v1443_v41 = vpop.permute.xlu0 %1442  ;;  %v1498_v43 = vpop.permute.xlu1 %1497 }
 0x4ad   : > { %v1448_v42 = vsel %vm1386_vm5, %v1443_v41, 0  ;;  %v1503_v45 = vsel %vm1386_vm5, %v1498_v43, 0 }
 0x4ae   : > { %3199 = vmatpush3.bf16.xpose.msra.mxu1 %v1448_v42 }
 0x4af   : > { %3204 = vmatprep.subr.bf16.mxu1 %v3817_v52 }
 0x4b0   : > { %v1440_v44 = vpop.permute.xlu0 %1439  ;;  %v1496_v47 = vpop.permute.xlu1 %1495 }
 0x4b4   : > { %v1553_v46 = vpop.permute.xlu0 %1552  ;;  %v1551_v49 = vpop.permute.xlu1 %1550 }
 0x4b5   : > { %3201 = vmatmul.mubr.msk.bf16.vlgmr.msra.gmra.mxu1 %vm1386_vm5, %v1440_v44  ;;  %v1558_v48 = vsel %vm1386_vm5, %v1553_v46, 0 }
 0x4b6   : > { %3205 = vmatpush3.bf16.xpose.msra.mxu1 %v1503_v45  ;;  %3206 = vmatprep.mubr.msk.bf16.mxu1 %vm3818_vm4, %v3817_v52 }
 0x4b7   : > { %3210 = vmatprep.subr.bf16.mxu1 %v3817_v52 }
 0x4bd   : > { %3207 = vmatmul.mubr.msk.bf16.vlgmr.msra.gmra.mxu1 %vm1386_vm5, %v1496_v47 }
 0x4be   : > { %3211 = vmatpush3.bf16.xpose.msra.mxu1 %v1558_v48  ;;  %3212 = vmatprep.mubr.msk.bf16.mxu1 %vm3818_vm4, %v3817_v52 }
 0x4bf   : > { %3222 = vmatprep.subr.bf16.mxu1 %v3817_v52 }
 0x4c5   : > { %3213 = vmatmul.mubr.msk.bf16.vlgmr.msra.gmra.mxu1 %vm1386_vm5, %v1551_v49 }
 0x4c6   : > { %3224 = vmatprep.mubr.msk.bf16.mxu1 %vm3818_vm4, %v3817_v52 }
 0x503   : > { %v1427_v50 = vpop.f32.mrf.mxu1 }
 0x504   : > { %v1434_v54 = vmul.f32 0.17677669, %v1427_v50 }
 0x505   : > { %v3196_v55 = vpop.f32.mrf.mxu1 }
 0x506   : > { %v1436_v56 = vadd.f32 %v1434_v54, %v1120_v53 }
 0x507   : > { %v1430_v57 = vpop.f32.mrf.mxu1 }
 0x508   : > { %v1435_v59 = vmul.f32 0.17677669, %v1430_v57  ;;  %v1606_v60 = vsel %vm1605_vm6, %v1436_v56, -inf }
 0x509   : > { %1607 = vmax.xlane.f32.xlu0 %v1606_v60  ;;  %v3197_v61 = vpop.f32.mrf.mxu1 }
 0x50a   : > { %v1437_v62 = vadd.f32 %v1435_v59, %v1121_v58 }
 0x50c   : > { %v1609_v63 = vsel %vm1605_vm6, %v1437_v62, -inf }
 0x50d   : > { %1610 = vmax.xlane.f32.xlu1 %v1609_v63 }
 0x575   : > { %v1484_v0 = vpop.f32.mrf.mxu1 }
 0x576   : > { %v1491_v1 = vmul.f32 0.17677669, %v1484_v0 }
 0x577   : > { %v3202_v2 = vpop.f32.mrf.mxu1 }
 0x578   : > { %v1493_v3 = vadd.f32 %v1491_v1, %v1120_v53 }
 0x579   : > { %v1487_v4 = vpop.f32.mrf.mxu1 }
 0x57a   : > { %v1492_v5 = vmul.f32 0.17677669, %v1487_v4  ;;  %v1612_v6 = vsel %vm1605_vm6, %v1493_v3, -inf }
 0x57b   : > { %1613 = vmax.xlane.f32.xlu0 %v1612_v6  ;;  %v3203_v7 = vpop.f32.mrf.mxu1 }
 0x57c   : > { %v1494_v10 = vadd.f32 %v1492_v5, %v1121_v58 }
 0x57d   : > { %v1539_v11 = vpop.f32.mrf.mxu1 }
 0x57e   : > { %v1546_v12 = vmul.f32 0.17677669, %v1539_v11  ;;  %v1615_v13 = vsel %vm1605_vm6, %v1494_v10, -inf }
 0x57f   : > { %1616 = vmax.xlane.f32.xlu0 %v1615_v13  ;;  %v3208_v14 = vpop.f32.mrf.mxu1 }
 0x580   : > { %v1548_v17 = vadd.f32 %v1546_v12, %v1120_v53 }
 0x581   : > { %v1542_v18 = vpop.f32.mrf.mxu1 }
 0x582   : > { %v1547_v19 = vmul.f32 0.17677669, %v1542_v18  ;;  %v1618_v21 = vsel %vm1605_vm6, %v1548_v17, -inf }
 0x583   : > { %1619 = vmax.xlane.f32.xlu1 %v1618_v21  ;;  %v3209_v22 = vpop.f32.mrf.mxu1 }
 0x584   : > { %v1549_v23 = vadd.f32 %v1547_v19, %v1121_v58 }
 0x585   : > { %v1594_v24 = vpop.f32.mrf.mxu1 }
 0x586   : > { %v1601_v25 = vmul.f32 0.17677669, %v1594_v24  ;;  %v1621_v26 = vsel %vm1605_vm6, %v1549_v23, -inf }
 0x587   : > { %1622 = vmax.xlane.f32.xlu0 %v1621_v26  ;;  %v3214_v27 = vpop.f32.mrf.mxu1 }
 0x588   : > { %v1603_v28 = vadd.f32 %v1601_v25, %v1120_v53 }
 0x589   : > { %v1597_v29 = vpop.f32.mrf.mxu1 }
 0x58a   : > { %v1602_v30 = vmul.f32 0.17677669, %v1597_v29  ;;  %v1624_v31 = vsel %vm1605_vm6, %v1603_v28, -inf }
 0x58b   : > { %1625 = vmax.xlane.f32.xlu1 %v1624_v31  ;;  %v3215_v32 = vpop.f32.mrf.mxu1 }
 0x58c   : > { %v1604_v33 = vadd.f32 %v1602_v30, %v1121_v58 }
 0x58e   : > { %v1627_v34 = vsel %vm1605_vm6, %v1604_v33, -inf }
 0x58f   : > { %1628 = vmax.xlane.f32.xlu0 %v1627_v34 }
 0x592   : > { %v1608_v38 = vpop.xlane.xlu0 %1607 }
 0x593   : > { %v1630_v39 = vsub.f32 %v1436_v56, %v1608_v38 }
 0x595   : > { %v1638_v43 = vmul.f32 1.442695, %v1630_v39 }
 0x596   : > { %v1611_v35 = vpop.xlane.xlu1 %1610 }
 0x597   : > { %v1631_v36 = vsub.f32 %v1437_v62, %v1611_v35 }
 0x599   : > { %v1640_v37 = vmul.f32 1.442695, %v1631_v36 }
 0x59b   : > { %3510 = vpow2.f32 %v1640_v37 }
 0x59c   : > { %1744 = vrot.lane.b32.xlu1 %v4313_v40, %s3820_s29  ;;  %3512 = vpow2.f32 %v1638_v43 }
 0x5a8   : > { %v3511_v41 = vpop.eup %3510 }
 0x5a9   : > { %v1657_v42 = vsel %vm1605_vm6, %v3511_v41, 0.0  ;;  %v3513_v44 = vpop.eup %3512 }
 0x5aa   : > { %1658 = vadd.xlane.f32.xlu0 %v1657_v42  ;;  %v1654_v45 = vsel %vm1605_vm6, %v3513_v44, 0.0 }
 0x5c0   : > { %1655 = vadd.xlane.f32.xlu1 %v1654_v45 }
 0x604   : > { %v1614_v46 = vpop.xlane.xlu0 %1613 }
 0x605   : > { %v1632_v47 = vsub.f32 %v1493_v3, %v1614_v46 }
 0x607   : > { %v1642_v48 = vmul.f32 1.442695, %v1632_v47 }
 0x608   : > { %v1617_v49 = vpop.xlane.xlu0 %1616 }
 0x609   : > { %3514 = vpow2.f32 %v1642_v48  ;;  %v1633_v50 = vsub.f32 %v1494_v10, %v1617_v49 }
 0x60b   : > { %v1644_v53 = vmul.f32 1.442695, %v1633_v50  ;;  %v3462_v50 = vld [vmem:[%s4188_s5 + $0x38] sm:$0xff]  }
 0x60c   : > { %v1620_v54 = vpop.xlane.xlu1 %1619 }
 0x60d   : > { %3516 = vpow2.f32 %v1644_v53  ;;  %v1634_v55 = vsub.f32 %v1548_v17, %v1620_v54  ;;  %v3463_v53 = vld [vmem:[%s4188_s5 + $0x30] sm:$0xff]   ;;  %v3464_v54 = vld [vmem:[%s4188_s5 + $0x28] sm:$0xff]  }
 0x60f   : > { %v1646_v56 = vmul.f32 1.442695, %v1634_v55 }
 0x610   : > { %v1623_v57 = vpop.xlane.xlu0 %1622 }
 0x611   : > { %3518 = vpow2.f32 %v1646_v56  ;;  %v1635_v58 = vsub.f32 %v1549_v23, %v1623_v57 }
 0x613   : > { %v1648_v59 = vmul.f32 1.442695, %v1635_v58 }
 0x614   : > { %v1626_v60 = vpop.xlane.xlu1 %1625 }
 0x615   : > { %3520 = vpow2.f32 %v1648_v59  ;;  %v1636_v61 = vsub.f32 %v1603_v28, %v1626_v60  ;;  %v3466_v59 = vld [vmem:[%s4188_s5 + $0x18] sm:$0xff]  }
 0x616   : > { %v3515_v62 = vpop.eup %3514 }
 0x617   : > { %v1650_v63 = vmul.f32 1.442695, %v1636_v61  ;;  %v1660_v0 = vsel %vm1605_vm6, %v3515_v62, 0.0 }
 0x618   : > { %1661 = vadd.xlane.f32.xlu1 %v1660_v0  ;;  %v1745_v1 = vpop.permute.xlu1 %1744  ;;  %v1629_v2 = vpop.xlane.xlu0 %1628 }
 0x619   : > { %3522 = vpow2.f32 %v1650_v63  ;;  %v1637_v3 = vsub.f32 %v1604_v33, %v1629_v2  ;;  %3223 = vmatpush3.bf16.msra.mxu1 %v1745_v1  ;;  %v3468_v1 = vld [vmem:[%s4188_s5 + $0x8] sm:$0xff]  }
 0x61a   : > { %v3517_v4 = vpop.eup %3516  ;;  %3234 = vmatprep.subr.bf16.mxu1 %v3817_v52 }
 0x61b   : > { %v1652_v5 = vmul.f32 1.442695, %v1637_v3  ;;  %v1663_v6 = vsel %vm1605_vm6, %v3517_v4, 0.0 }
 0x61c   : > { %1664 = vadd.xlane.f32.xlu0 %v1663_v6 }
 0x61d   : > { %3524 = vpow2.f32 %v1652_v5  ;;  %v3469_v5 = vld [vmem:[%s4188_s5] sm:$0xff]  }
 0x61e   : > { %v3519_v7 = vpop.eup %3518 }
 0x61f   : > { %v1666_v10 = vsel %vm1605_vm6, %v3519_v7, 0.0 }
 0x620   : > { %1667 = vadd.xlane.f32.xlu1 %v1666_v10 }
 0x622   : > { %v3521_v11 = vpop.eup %3520 }
 0x623   : > { %v1669_v12 = vsel %vm1605_vm6, %v3521_v11, 0.0 }
 0x624   : > { %1670 = vadd.xlane.f32.xlu0 %v1669_v12 }
 0x626   : > { %v3523_v13 = vpop.eup %3522 }
 0x627   : > { %v1672_v14 = vsel %vm1605_vm6, %v3523_v13, 0.0 }
 0x628   : > { %1673 = vadd.xlane.f32.xlu1 %v1672_v14 }
 0x62a   : > { %v3525_v17 = vpop.eup %3524 }
 0x62b   : > { %v1675_v18 = vsel %vm1605_vm6, %v3525_v17, 0.0 }
 0x62c   : > { %1676 = vadd.xlane.f32.xlu0 %v1675_v18 }
 0x633   : > { %v1659_v19 = vpop.xlane.xlu0 %1658 }
 0x634   : > { %3526 = vrcp.f32 %v1659_v19 }
 0x639   : > { %1838 = vrot.lane.b32.xlu1 %v4313_v40, %s3821_s20 }
 0x641   : > { %v3527_v22 = vpop.eup %3526 }
 0x642   : > { %1791 = vrot.lane.b32.xlu0 %v4313_v40, %s3819_s24  ;;  %v1687_v25 = vmul.f32 %v3527_v22, %v3511_v41 }
 0x649   : > { %v1656_v21 = vpop.xlane.xlu1 %1655 }
 0x64a   : > { %3528 = vrcp.f32 %v1656_v21 }
 0x657   : > { %v3529_v23 = vpop.eup %3528 }
 0x658   : > { %v1686_v24 = vmul.f32 %v3529_v23, %v3513_v44 }
 0x65a   : > { %v1694_v26 = vpack.c.bf16 %v1687_v25, %v1686_v24 }
 0x65c   : > { %3219 = vmatmul.mubr.msk.bf16.vlgmr.msra.gmra.mxu0 %vm1605_vm6, %v1694_v26 }
 0x65d   : > { %3230 = vmatprep.mubr.msk.bf16.mxu0 %vm3818_vm4, %v3817_v52 }
 0x6a1   : > { %v1662_v27 = vpop.xlane.xlu1 %1661 }
 0x6a2   : > { %3530 = vrcp.f32 %v1662_v27 }
 0x6a5   : > { %v1665_v28 = vpop.xlane.xlu0 %1664 }
 0x6a6   : > { %3532 = vrcp.f32 %v1665_v28 }
 0x6a9   : > { %v1668_v29 = vpop.xlane.xlu1 %1667 }
 0x6aa   : > { %3534 = vrcp.f32 %v1668_v29 }
 0x6ad   : > { %v1671_v40 = vpop.xlane.xlu0 %1670 }
 0x6ae   : > { %3536 = vrcp.f32 %v1671_v40 }
 0x6af   : > { %v3531_v30 = vpop.eup %3530 }
 0x6b0   : > { %v1688_v33 = vmul.f32 %v3531_v30, %v3515_v62  ;;  %v3467_v62 = vld [vmem:[%s4188_s5 + $0x10] sm:$0xff]  }
 0x6b1   : > { %v1674_v31 = vpop.xlane.xlu1 %1673 }
 0x6b2   : > { %3538 = vrcp.f32 %v1674_v31 }
 0x6b3   : > { %v3533_v32 = vpop.eup %3532 }
 0x6b4   : > { %v1689_v34 = vmul.f32 %v3533_v32, %v3517_v4 }
 0x6b5   : > { %v1677_v35 = vpop.xlane.xlu0 %1676  ;;  %v1839_v37 = vpop.permute.xlu1 %1838 }
 0x6b6   : > { %3540 = vrcp.f32 %v1677_v35  ;;  %v1695_v36 = vpack.c.bf16 %v1689_v34, %v1688_v33  ;;  %v2999_v33 = vld [vmem:[%s4599_s25] ss:$0 sm:$0xff]  ;;  %s4606_s25 = sld [smem:[#allocation39_spill]] (!%p3045_p10) }
 0x6b7   : > { %v3535_v38 = vpop.eup %3534 }
 0x6b8   : > { %3225 = vmatmul.mubr.msk.bf16.vlgmr.msra.gmra.mxu1 %vm1605_vm6, %v1695_v36  ;;  %v1690_v42 = vmul.f32 %v3535_v38, %v3519_v7 }
 0x6b9   : > { %3235 = vmatpush3.bf16.msra.mxu1 %v1839_v37  ;;  %v1792_v39 = vpop.permute.xlu0 %1791  ;;  %3236 = vmatprep.mubr.msk.bf16.mxu1 %vm3818_vm4, %v3817_v52 }
 0x6ba   : > { %3229 = vmatpush3.bf16.msra.mxu0 %v1792_v39 }
 0x6bb   : > { %v3537_v41 = vpop.eup %3536  ;;  %3240 = vmatprep.subr.bf16.mxu0 %v3817_v52 }
 0x6bc   : > { %v1691_v43 = vmul.f32 %v3537_v41, %v3521_v11 }
 0x6be   : > { %v1696_v44 = vpack.c.bf16 %v1691_v43, %v1690_v42  ;;  %v3470_v43 = vld [vmem:[%s4163_s23 + $0x70] ss:$8 sps:$4 sm:$0xff]  }
 0x6bf   : > { %v3539_v45 = vpop.eup %3538 }
 0x6c0   : > { %3231 = vmatmul.mubr.msk.bf16.vlgmr.msra.gmra.mxu0 %vm1605_vm6, %v1696_v44  ;;  %v1692_v47 = vmul.f32 %v3539_v45, %v3523_v13  ;;  %v3472_v44 = vld [vmem:[%s4163_s23 + $0x74] ss:$8 sps:$4 sm:$0xff]  }
 0x6c1   : > { %3256 = vmatprep.mubr.msk.bf16.mxu0 %vm3818_vm4, %v3817_v52  ;;  %3241 = vmatpush3.bf16.msra.mxu0 %v3462_v50 }
 0x6c2   : > { %3242 = vmatprep.subr.bf16.mxu0 %v3817_v52  ;;  %2182 = vmatprep.subr.bf16.mxu1 %v3472_v44 }
 0x6c3   : > { %v3541_v46 = vpop.eup %3540 }
 0x6c4   : > { %v1693_v48 = vmul.f32 %v3541_v46, %v3525_v17 }
 0x6c5   : > { %3243 = vmatpush3.bf16.msra.mxu0 %v3463_v53  ;;  %v3475_v53 = vld [vmem:[%s4163_s23 + $0x64] ss:$8 sps:$4 sm:$0xff]  }
 0x6c6   : > { %v1697_v49 = vpack.c.bf16 %v1693_v48, %v1692_v47  ;;  %3244 = vmatprep.subr.bf16.mxu0 %v3817_v52 }
 0x6c8   : > { %3237 = vmatmul.mubr.msk.bf16.vlgmr.msra.gmra.mxu1 %vm1605_vm6, %v1697_v49 }
 0x6c9   : > { %2214 = vmatprep.mubr.bf16.mxu1 %v3816_v51  ;;  %3245 = vmatpush3.bf16.msra.mxu0 %v3464_v54  ;;  %v3465_v51 = vld [vmem:[%s4188_s5 + $0x20] sm:$0xff]   ;;  %v3473_v54 = vld [vmem:[%s4163_s23 + $0x60] ss:$8 sps:$4 sm:$0xff]  }
 0x6ca   : > { %3246 = vmatprep.subr.bf16.mxu0 %v3817_v52  ;;  %2183 = vmatpush1.bf16.msra.mxu1 %v3470_v43 }
 0x6cb   : > { %2184 = vmatprep.subr.bf16.mxu1 %v3475_v53 }
 0x6cd   : > { %3247 = vmatpush3.bf16.msra.mxu0 %v3465_v51  ;;  %v3484_v51 = vld [vmem:[%s4163_s23 + $0x34] ss:$8 sps:$4 sm:$0xff]  }
 0x6ce   : > { %3248 = vmatprep.subr.bf16.mxu0 %v3817_v52  ;;  %2185 = vmatpush1.bf16.msra.mxu1 %v3473_v54 }
 0x6d1   : > { %3249 = vmatpush3.bf16.msra.mxu0 %v3466_v59  ;;  %v3482_v59 = vld [vmem:[%s4163_s23 + $0x30] ss:$8 sps:$4 sm:$0xff]  }
 0x6d2   : > { %3250 = vmatprep.subr.bf16.mxu0 %v3817_v52 }
 0x6d5   : > { %3251 = vmatpush3.bf16.msra.mxu0 %v3467_v62  ;;  %v3490_v62 = vld [vmem:[%s4163_s23 + $0x14] ss:$8 sps:$4 sm:$0xff]  }
 0x6d6   : > { %3252 = vmatprep.subr.bf16.mxu0 %v3817_v52 }
 0x6d9   : > { %3253 = vmatpush3.bf16.msra.mxu0 %v3468_v1  ;;  %v3491_v1 = vld [vmem:[%s4163_s23] ss:$8 sps:$4 sm:$0xff]  }
 0x6da   : > { %3254 = vmatprep.subr.bf16.mxu0 %v3817_v52 }
 0x6dd   : > { %3255 = vmatpush3.bf16.msra.mxu0 %v3469_v5 }
 0x71c   : > { %v1736_v55 = vpop.f32.mrf.mxu0 }
 0x71e   : > { %v3220_v56 = vpop.f32.mrf.mxu0 }
 0x71f   : > { %v3476_v56 = vld [vmem:[%s4163_s23 + $0x50] ss:$8 sps:$4 sm:$0xff]  }
 0x720   : > { %v1739_v57 = vpop.f32.mrf.mxu0 }
 0x722   : > { %v3221_v58 = vpop.f32.mrf.mxu0 }
 0x723   : > { %v3481_v58 = vld [vmem:[%s4163_s23 + $0x44] ss:$8 sps:$4 sm:$0xff]  }
 0x778   : > { %v1784_v60 = vpop.f32.mrf.mxu1 }
 0x77a   : > { %v3226_v61 = vpop.f32.mrf.mxu1 }
 0x77b   : > { %v3485_v61 = vld [vmem:[%s4163_s23 + $0x20] ss:$8 sps:$4 sm:$0xff]  }
 0x77c   : > { %v1787_v63 = vpop.f32.mrf.mxu1 }
 0x77d   : > { %v3415_v0 = vpack.i.bf16 %v1787_v63, %v1784_v60  ;;  %v3487_v60 = vld [vmem:[%s4163_s23 + $0x24] ss:$8 sps:$4 sm:$0xff]   ;;  %v3488_v63 = vld [vmem:[%s4163_s23 + $0x10] ss:$8 sps:$4 sm:$0xff]  }
 0x77e   : > { %v3227_v2 = vpop.f32.mrf.mxu1 }
 0x77f   : > { %3416 = vrot.lane.b32.xlu1 %v3415_v0, %s3821_s20  ;;  %v3493_v0 = vld [vmem:[%s4163_s23 + $0x4] ss:$8 sps:$4 sm:$0xff]  }
 0x780   : > { %v1831_v3 = vpop.f32.mrf.mxu0 }
 0x782   : > { %v3232_v4 = vpop.f32.mrf.mxu0 }
 0x784   : > { %v1834_v6 = vpop.f32.mrf.mxu0 }
 0x785   : > { %v3420_v7 = vpack.i.bf16 %v1834_v6, %v1831_v3 }
 0x786   : > { %v3233_v10 = vpop.f32.mrf.mxu0 }
 0x787   : > { %3421 = vrot.lane.b32.xlu0 %v3420_v7, %s3819_s24 }
 0x788   : > { %v1878_v11 = vpop.f32.mrf.mxu1 }
 0x78a   : > { %v3238_v12 = vpop.f32.mrf.mxu1 }
 0x78c   : > { %v1881_v13 = vpop.f32.mrf.mxu1 }
 0x78d   : > { %v3425_v14 = vpack.i.bf16 %v1881_v13, %v1878_v11 }
 0x78e   : > { %v3239_v17 = vpop.f32.mrf.mxu1 }
 0x78f   : > { %3426 = vrot.lane.b32.xlu1 %v3425_v14, %s3820_s29 }
 0x7f1   : > { %v3417_v18 = vpop.permute.xlu1 %3416 }
 0x7f2   : > { %v3419_v21 = vunpack.i.h.bf16 %v3417_v18  ;;  %v3418_v22 = vunpack.i.l.bf16 %v3417_v18  ;;  %v3009_v18 = vld [vmem:[%s934_s12] ss:$0 sm:$0xff] }
 0x7f4   : > { %v1910_v25 = vsel %vm1386_vm5, %v1739_v57, %v3419_v21  ;;  %v1909_v26 = vsel %vm1386_vm5, %v1736_v55, %v3418_v22  ;;  %v3478_v55 = vld [vmem:[%s4163_s23 + $0x54] ss:$8 sps:$4 sm:$0xff]   ;;  %v3479_v57 = vld [vmem:[%s4163_s23 + $0x40] ss:$8 sps:$4 sm:$0xff]   ;;  %s4600_s23 = scalar_lea.vmem %s4506_s10, %s4181_s19 }
 0x7f5   : > { %2186 = vmatprep.subr.bf16.mxu1 %v3478_v55  ;;  %v3008_v12 = vld [vmem:[%s4600_s23] ss:$0 sm:$0xff] }
 0x7f6   : > { %2187 = vmatpush1.bf16.msra.mxu1 %v3476_v56 }
 0x7f7   : > { %2188 = vmatprep.subr.bf16.mxu1 %v3481_v58 }
 0x7f9   : > { %v3422_v19 = vpop.permute.xlu0 %3421 }
 0x7fa   : > { %v3424_v52 = vunpack.i.h.bf16 %v3422_v19  ;;  %v3423_v23 = vunpack.i.l.bf16 %v3422_v19  ;;  %2189 = vmatpush1.bf16.msra.mxu1 %v3479_v57 }
 0x7fb   : > { %2190 = vmatprep.subr.bf16.mxu1 %v3484_v51 }
 0x7fc   : > { %v1912_v29 = vsel %vm1911_vm7, %v1909_v26, %v3423_v23  ;;  %v1913_v40 = vsel %vm1911_vm7, %v1910_v25, %v3424_v52  ;;  %v3494_v23 = vld [vmem:[%s4165_s26 + $0x78] sm:$0xff]   ;;  %v3496_v25 = vld [vmem:[%s4165_s26 + $0x70] sm:$0xff]  }
 0x7fd   : > { %3112 = vmatprep.subr.bf16.mxu0 %v3494_v23  ;;  %v3497_v26 = vld [vmem:[%s4165_s26 + $0x30] sm:$0xff]  }
 0x7fe   : > { %2191 = vmatpush1.bf16.msra.mxu1 %v3482_v59 }
 0x7ff   : > { %2192 = vmatprep.subr.bf16.mxu1 %v3487_v60 }
 0x801   : > { %v3427_v24 = vpop.permute.xlu1 %3426 }
 0x802   : > { %v3429_v27 = vunpack.i.h.bf16 %v3427_v24  ;;  %v3428_v28 = vunpack.i.l.bf16 %v3427_v24  ;;  %2193 = vmatpush1.bf16.msra.mxu1 %v3485_v61  ;;  %v3495_v24 = vld [vmem:[%s4165_s26 + $0x38] sm:$0xff]  }
 0x803   : > { %2194 = vmatprep.subr.bf16.mxu1 %v3490_v62 }
 0x804   : > { %v1916_v30 = vsel %vm1914_vm8, %v1913_v40, %v3429_v27  ;;  %v1915_v31 = vsel %vm1914_vm8, %v1912_v29, %v3428_v28  ;;  %v3498_v27 = vld [vmem:[%s4165_s26 + $0x68] sm:$0xff]   ;;  %v3500_v29 = vld [vmem:[%s4165_s26 + $0x60] sm:$0xff]  }
 0x805   : > { %v1917_v32 = vpack.c.bf16 %v1916_v30, %v1915_v31  ;;  %v3499_v28 = vld [vmem:[%s4165_s26 + $0x28] sm:$0xff]   ;;  %v3501_v40 = vld [vmem:[%s4165_s26 + $0x20] sm:$0xff]   ;;  %v3502_v30 = vld [vmem:[%s4165_s26 + $0x58] sm:$0xff]  }
 0x806   : > { %2195 = vmatpush1.bf16.msra.mxu1 %v3488_v63  ;;  %v3503_v31 = vld [vmem:[%s4165_s26 + $0x18] sm:$0xff]  }
 0x807   : > { %3257 = vmatmul.mubr.bf16.vlgmr.msra.gmra.mxu0 %v1917_v32  ;;  %2196 = vmatprep.subr.bf16.mxu1 %v3493_v0  ;;  %v3504_v32 = vld [vmem:[%s4165_s26 + $0x50] sm:$0xff]  }
 0x808   : > { %3113 = vmatpush3.bf16.msra.mxu0 %v3495_v24 }
 0x809   : > { %3114 = vmatprep.subr.bf16.mxu0 %v3496_v25 }
 0x80a   : > { %2197 = vmatpush1.bf16.msra.mxu1 %v3491_v1 }
 0x80c   : > { %3115 = vmatpush3.bf16.msra.mxu0 %v3497_v26 }
 0x80d   : > { %3116 = vmatprep.subr.bf16.mxu0 %v3498_v27  ;;  %v3026_v27 = vld [vmem:[%s941_s30] ss:$0 sm:$0xff] }
 0x810   : > { %3117 = vmatpush3.bf16.msra.mxu0 %v3499_v28 }
 0x811   : > { %3118 = vmatprep.subr.bf16.mxu0 %v3500_v29 }
 0x814   : > { %3119 = vmatpush3.bf16.msra.mxu0 %v3501_v40 }
 0x815   : > { %3120 = vmatprep.subr.bf16.mxu0 %v3502_v30 }
 0x818   : > { %3121 = vmatpush3.bf16.msra.mxu0 %v3503_v31 }
 0x819   : > { %3122 = vmatprep.subr.bf16.mxu0 %v3504_v32 }
 0x8c7   : > { %v2023_v34 = vpop.f32.mrf.mxu0 }
 0x8c8   : > { %v2024_v35 = vadd.f32 %v2999_v33, %v2023_v34  ;;  %v3506_v34 = vld [vmem:[%s4165_s26 + $0x48] sm:$0xff]  }
 0x8c9   : > { %v3258_v36 = vpop.f32.mrf.mxu0 }
 0x8ca   : > { %v2030_v37 = vadd.f32 %v2024_v35, %v4271_v8  ;;  %v3507_v35 = vld [vmem:[%s4165_s26 + $0x8] sm:$0xff]   ;;  %v3508_v36 = vld [vmem:[%s4165_s26 + $0x40] sm:$0xff]  }
 0x8cb   : > { %v2026_v38 = vpop.f32.mrf.mxu0 }
 0x8cc   : > { %v2027_v39 = vadd.f32 %v2999_v33, %v2026_v38  ;;  %2034 = vadd.xlane.f32.xlu0 %v2030_v37  ;;  %v3505_v33 = vld [vmem:[%s4165_s26 + $0x10] sm:$0xff]  }
 0x8cd   : > { %v3259_v41 = vpop.f32.mrf.mxu0  ;;  %3123 = vmatpush3.bf16.msra.mxu0 %v3505_v33  ;;  %v2090_v38 = vld [vmem:[%s4211_s3] sm:$0x3] }
 0x8ce   : > { %v2031_v42 = vadd.f32 %v2027_v39, %v4273_v9  ;;  %3124 = vmatprep.subr.bf16.mxu0 %v3506_v34  ;;  %v2095_v39 = vrot.slane %v2090_v38, %v1159_v20  ;;  %v2099_v41 = vrot.slane %v2090_v38, %v1163_v16 }
 0x8d0   : > { %2036 = vadd.xlane.f32.xlu1 %v2031_v42 }
 0x8d1   : > { %3125 = vmatpush3.bf16.msra.mxu0 %v3507_v35 }
 0x8d2   : > { %3126 = vmatprep.subr.bf16.mxu0 %v3508_v36 }
 0x955   : > { %v2035_v45 = vpop.xlane.xlu0 %2034 }
 0x956   : > { %v2039_v46 = vmul.f32 0.0078125, %v2035_v45 }
 0x958   : > { %v2041_v47 = vsub.f32 %v2030_v37, %v2039_v46  ;;  %v3509_v37 = vld [vmem:[%s4165_s26] sm:$0xff]  }
 0x959   : > { %v2037_v8 = vpop.xlane.xlu1 %2036  ;;  %3127 = vmatpush3.bf16.msra.mxu0 %v3509_v37 }
 0x95a   : > { %v2040_v48 = vmul.f32 0.0078125, %v2037_v8  ;;  %v2043_v49 = vmul.f32 %v2041_v47, %v2041_v47 }
 0x95c   : > { %v2042_v50 = vsub.f32 %v2031_v42, %v2040_v48  ;;  %2045 = vadd.xlane.f32.xlu0 %v2043_v49 }
 0x95e   : > { %v2044_v9 = vmul.f32 %v2042_v50, %v2042_v50 }
 0x960   : > { %2047 = vadd.xlane.f32.xlu0 %v2044_v9 }
 0x9e5   : > { %v2046_v2 = vpop.xlane.xlu0 %2045 }
 0x9e6   : > { %v2049_v3 = vmul.f32 0.0078125, %v2046_v2 }
 0x9e8   : > { %v2051_v4 = vadd.f32 1e-12, %v2049_v3 }
 0x9e9   : > { %v2048_v5 = vpop.xlane.xlu0 %2047 }
 0x9ea   : > { %3542 = vrsqrt.f32 %v2051_v4  ;;  %v2050_v6 = vmul.f32 0.0078125, %v2048_v5 }
 0x9ec   : > { %v2052_v7 = vadd.f32 1e-12, %v2050_v6 }
 0x9ee   : > { %3544 = vrsqrt.f32 %v2052_v7 }
 0x9f7   : > { %v3543_v10 = vpop.eup %3542 }
 0x9f8   : > { %v2055_v11 = vmul.f32 %v3543_v10, %v2041_v47 }
 0x9fa   : > { %v2063_v17 = vmul.f32 %v3008_v12, %v2055_v11 }
 0x9fb   : > { %v3545_v13 = vpop.eup %3544 }
 0x9fc   : > { %v2056_v14 = vmul.f32 %v3545_v13, %v2042_v50  ;;  %v4426_v21 = vadd.f32 %v3009_v18, %v2063_v17 }
 0x9fe   : > { %v2064_v19 = vmul.f32 %v3008_v12, %v2056_v14 }
 0xa00   : > { %v4428_v22 = vadd.f32 %v3009_v18, %v2064_v19 }
 0xa02   : > { %v2073_v52 = vpack.c.bf16 %v4428_v22, %v4426_v21 }
 0xa04   : > { %2215 = vmatmul.mubr.bf16.vlgmr.msra.gmra.mxu1 %v2073_v52 }
 0xac4   : > { %v2216_v42 = vpop.f32.mrf.mxu1 }
 0xac5   : > { %v2217_v43 = vadd.f32 %v2216_v42, %v2095_v39 }
 0xac6   : > { %v2218_v44 = vpop.f32.mrf.mxu1 }
 0xac7   : > { %v2229_v45 = vmul.f32 %v2217_v43, %v2217_v43  ;;  %v2219_v46 = vadd.f32 %v2218_v44, %v2099_v41  ;;  %v2225_v17 = vmul.f32 0.5, %v2217_v43 }
 0xac8   : > { %v2220_v47 = vpop.f32.mrf.mxu1 }
 0xac9   : > { %v2233_v8 = vmul.f32 %v2229_v45, %v2217_v43  ;;  %v2230_v48 = vmul.f32 %v2219_v46, %v2219_v46  ;;  %v2221_v49 = vadd.f32 %v2220_v47, %v2095_v39  ;;  %v2226_v12 = vmul.f32 0.5, %v2219_v46 }
 0xaca   : > { %v2222_v50 = vpop.f32.mrf.mxu1 }
 0xacb   : > { %v2237_v9 = vmul.f32 0.044715, %v2233_v8  ;;  %v2234_v53 = vmul.f32 %v2230_v48, %v2219_v46  ;;  %v2231_v54 = vmul.f32 %v2221_v49, %v2221_v49  ;;  %v2223_v55 = vadd.f32 %v2222_v50, %v2099_v41 }
 0xacc   : > { %v2227_v10 = vmul.f32 0.5, %v2221_v49 }
 0xacd   : > { %v2241_v56 = vadd.f32 %v2237_v9, %v2217_v43  ;;  %v2238_v57 = vmul.f32 0.044715, %v2234_v53  ;;  %v2235_v20 = vmul.f32 %v2231_v54, %v2221_v49  ;;  %v2232_v58 = vmul.f32 %v2223_v55, %v2223_v55  ;;  %v3044_v9 = vld [vmem:[%s947_s14] ss:$0 sm:$0xff] }
 0xace   : > { %v2228_v13 = vmul.f32 0.5, %v2223_v55 }
 0xacf   : > { %v2245_v15 = vmul.f32 0.7978846, %v2241_v56  ;;  %v2242_v16 = vadd.f32 %v2238_v57, %v2219_v46  ;;  %v2239_v51 = vmul.f32 0.044715, %v2235_v20  ;;  %v2236_v59 = vmul.f32 %v2232_v58, %v2223_v55 }
 0xad1   : > { %v2246_v60 = vmul.f32 0.7978846, %v2242_v16  ;;  %v2243_v61 = vadd.f32 %v2239_v51, %v2221_v49  ;;  %v2240_v62 = vmul.f32 0.044715, %v2236_v59  ;;  %3546 = vtanh.f32 %v2245_v15  ;;  %v3043_v49 = vld [vmem:[%s944_s8] ss:$0 sm:$0xff] }
 0xad3   : > { %v2247_v63 = vmul.f32 0.7978846, %v2243_v61  ;;  %3548 = vtanh.f32 %v2246_v60  ;;  %v2244_v0 = vadd.f32 %v2240_v62, %v2223_v55 }
 0xad5   : > { %3550 = vtanh.f32 %v2247_v63  ;;  %v2248_v1 = vmul.f32 0.7978846, %v2244_v0 }
 0xad7   : > { %3552 = vtanh.f32 %v2248_v1 }
 0xade   : > { %v3547_v2 = vpop.eup %3546 }
 0xadf   : > { %v2253_v11 = vadd.f32 1.0, %v3547_v2 }
 0xae0   : > { %v3549_v3 = vpop.eup %3548 }
 0xae1   : > { %v2254_v6 = vadd.f32 1.0, %v3549_v3  ;;  %v2257_v23 = vmul.f32 %v2253_v11, %v2225_v17 }
 0xae2   : > { %v3551_v4 = vpop.eup %3550 }
 0xae3   : > { %v2255_v5 = vadd.f32 1.0, %v3551_v4  ;;  %v2258_v19 = vmul.f32 %v2254_v6, %v2226_v12 }
 0xae4   : > { %v3553_v7 = vpop.eup %3552 }
 0xae5   : > { %v2256_v14 = vadd.f32 1.0, %v3553_v7  ;;  %v2259_v18 = vmul.f32 %v2255_v5, %v2227_v10 }
 0xae7   : > { %v2260_v52 = vmul.f32 %v2256_v14, %v2228_v13  ;;  %v2261_v25 = vpack.c.bf16 %v2259_v18, %v2257_v23 }
 0xae9   : > { %v2262_v24 = vpack.c.bf16 %v2260_v52, %v2258_v19 }
 0xaeb   : > { %2430 = vmatprep.mubr.bf16.mxu0 %v2262_v24 }
 0xaec   : > { %2431 = vmatmul.mubr.bf16.vlgmr.msra.gmra.mxu0 %v2261_v25 }
 0xbac   : > { %v3128_v26 = vpop.f32.mrf.mxu0 }
 0xbae   : > { %v3129_v28 = vpop.f32.mrf.mxu0 }
 0xbaf   : > { %v3130_v29 = vadd.f32 %v3129_v28, %v3128_v26 }
 0xbb0   : > { %v3131_v40 = vpop.f32.mrf.mxu0 }
 0xbb1   : > { %v2433_v30 = vadd.f32 %v3130_v29, %v3026_v27 }
 0xbb2   : > { %v3132_v31 = vpop.f32.mrf.mxu0 }
 0xbb3   : > { %v3133_v32 = vadd.f32 %v3132_v31, %v3131_v40  ;;  %v2439_v33 = vadd.f32 %v2433_v30, %v4426_v21 }
 0xbb5   : > { %v2436_v34 = vadd.f32 %v3133_v32, %v3026_v27  ;;  %2443 = vadd.xlane.f32.xlu1 %v2439_v33 }
 0xbb7   : > { %v2440_v35 = vadd.f32 %v2436_v34, %v4428_v22 }
 0xbb9   : > { %2445 = vadd.xlane.f32.xlu0 %v2440_v35 }
 0xc3e   : > { %v2444_v36 = vpop.xlane.xlu1 %2443 }
 0xc3f   : > { %v2447_v37 = vmul.f32 0.0078125, %v2444_v36 }
 0xc41   : > { %v2449_v38 = vsub.f32 %v2439_v33, %v2447_v37 }
 0xc42   : > { %v2446_v39 = vpop.xlane.xlu0 %2445 }
 0xc43   : > { %v2448_v41 = vmul.f32 0.0078125, %v2446_v39  ;;  %v2451_v42 = vmul.f32 %v2449_v38, %v2449_v38 }
 0xc45   : > { %v2450_v43 = vsub.f32 %v2440_v35, %v2448_v41  ;;  %2453 = vadd.xlane.f32.xlu1 %v2451_v42 }
 0xc47   : > { %v2452_v44 = vmul.f32 %v2450_v43, %v2450_v43 }
 0xc49   : > { %2455 = vadd.xlane.f32.xlu0 %v2452_v44 }
 0xcce   : > { %v2454_v45 = vpop.xlane.xlu1 %2453 }
 0xccf   : > { %v2457_v46 = vmul.f32 0.0078125, %v2454_v45 }
 0xcd1   : > { %v2459_v21 = vadd.f32 1e-12, %v2457_v46 }
 0xcd2   : > { %v2456_v47 = vpop.xlane.xlu0 %2455 }
 0xcd3   : > { %3554 = vrsqrt.f32 %v2459_v21  ;;  %v2458_v8 = vmul.f32 0.0078125, %v2456_v47 }
 0xcd5   : > { %v2460_v22 = vadd.f32 1e-12, %v2458_v8 }
 0xcd7   : > { %3556 = vrsqrt.f32 %v2460_v22 }
 0xce0   : > { %v3555_v48 = vpop.eup %3554 }
 0xce1   : > { %v2463_v50 = vmul.f32 %v3555_v48, %v2449_v38 }
 0xce3   : > { %v2471_v53 = vmul.f32 %v3043_v49, %v2463_v50 }
 0xce4   : > { %v3557_v54 = vpop.eup %3556 }
 0xce5   : > { %v2479_v55 = vadd.f32 %v3044_v9, %v2471_v53  ;;  %v2464_v56 = vmul.f32 %v3557_v54, %v2450_v43 }
 0xce7   : > { %2481 = vst [vmem:[#allocation2] sm:$0xff] %v2479_v55  ;;  %v2472_v57 = vmul.f32 %v3043_v49, %v2464_v56  ;;  %2486 = sbr.rel (%p3045_p10) target bundleno = 3790 (0xece), region = 140 }
 0xce9   : > { %v2480_v20 = vadd.f32 %v3044_v9, %v2472_v57 }
 0xceb   : > { %2482 = vst [vmem:[#allocation2 + $0x8] sm:$0xff] %v2480_v20 }
 0xcec   : > { %v3558_v58 = vld [vmem:[#allocation10 + $0x38] sm:$0xff]   ;;  %v3822_v15 = vmov 0.0   ;;  %v3559_v16 = vld [vmem:[#allocation10 + $0x30] sm:$0xff]   ;;  %vm3823_vm9 = vmmov 0   ;;  %v3560_v51 = vld [vmem:[#allocation10 + $0x28] sm:$0xff]   ;;  %v2487_v2 = vpack.c.bf16 %v2480_v20, %v2479_v55 }
 0xced   : > { %3260 = vmatprep.subr.bf16.mxu0 %v3822_v15  ;;  %3280 = vmatprep.subr.bf16.mxu1 %v3822_v15  ;;  %v3566_v59 = vld [vmem:[#allocation11 + $0x38] sm:$0xff]   ;;  %v3561_v60 = vld [vmem:[#allocation10 + $0x20] sm:$0xff]   ;;  %v3567_v61 = vld [vmem:[#allocation11 + $0x30] sm:$0xff]  }
 0xcee   : > { %3261 = vmatpush3.bf16.msra.mxu0 %v3558_v58  ;;  %3276 = vmatprep.mubr.msk.bf16.mxu0 %vm3823_vm9, %v3822_v15  ;;  %v3562_v62 = vld [vmem:[#allocation10 + $0x18] sm:$0xff]   ;;  %v3563_v63 = vld [vmem:[#allocation10 + $0x10] sm:$0xff]   ;;  %v3564_v0 = vld [vmem:[#allocation10 + $0x8] sm:$0xff]  }
 0xcef   : > { %3262 = vmatprep.subr.bf16.mxu0 %v3822_v15  ;;  %3296 = vmatprep.mubr.msk.bf16.mxu1 %vm3823_vm9, %v3822_v15  ;;  %v3565_v1 = vld [vmem:[#allocation10] sm:$0xff]   ;;  %v3568_v3 = vld [vmem:[#allocation11 + $0x28] sm:$0xff]   ;;  %v3570_v5 = vld [vmem:[#allocation11 + $0x18] sm:$0xff]  }
 0xcf0   : > { %3281 = vmatpush3.bf16.msra.mxu1 %v3566_v59  ;;  %v3569_v4 = vld [vmem:[#allocation11 + $0x20] sm:$0xff]   ;;  %v3571_v6 = vld [vmem:[#allocation11 + $0x10] sm:$0xff]   ;;  %v3572_v7 = vld [vmem:[#allocation11 + $0x8] sm:$0xff]  }
 0xcf1   : > { %3282 = vmatprep.subr.bf16.mxu1 %v3822_v15  ;;  %v3573_v10 = vld [vmem:[#allocation11] sm:$0xff]   ;;  %v3046_v11 = vld [vmem:[%s4604_s4] ss:$0 sm:$0xff] }
 0xcf2   : > { %3263 = vmatpush3.bf16.msra.mxu0 %v3559_v16  ;;  %v3055_v25 = vld [vmem:[%s4605_s2] ss:$0 sm:$0xff] }
 0xcf3   : > { %3264 = vmatprep.subr.bf16.mxu0 %v3822_v15 }
 0xcf4   : > { %3283 = vmatpush3.bf16.msra.mxu1 %v3567_v61 }
 0xcf5   : > { %3284 = vmatprep.subr.bf16.mxu1 %v3822_v15 }
 0xcf6   : > { %3265 = vmatpush3.bf16.msra.mxu0 %v3560_v51 }
 0xcf7   : > { %3266 = vmatprep.subr.bf16.mxu0 %v3822_v15 }
 0xcf8   : > { %3285 = vmatpush3.bf16.msra.mxu1 %v3568_v3 }
 0xcf9   : > { %3286 = vmatprep.subr.bf16.mxu1 %v3822_v15 }
 0xcfa   : > { %3267 = vmatpush3.bf16.msra.mxu0 %v3561_v60 }
 0xcfb   : > { %3268 = vmatprep.subr.bf16.mxu0 %v3822_v15 }
 0xcfc   : > { %3287 = vmatpush3.bf16.msra.mxu1 %v3569_v4 }
 0xcfd   : > { %3288 = vmatprep.subr.bf16.mxu1 %v3822_v15 }
 0xcfe   : > { %3269 = vmatpush3.bf16.msra.mxu0 %v3562_v62 }
 0xcff   : > { %3270 = vmatprep.subr.bf16.mxu0 %v3822_v15 }
 0xd00   : > { %3289 = vmatpush3.bf16.msra.mxu1 %v3570_v5 }
 0xd01   : > { %3290 = vmatprep.subr.bf16.mxu1 %v3822_v15 }
 0xd02   : > { %3271 = vmatpush3.bf16.msra.mxu0 %v3563_v63 }
 0xd03   : > { %3272 = vmatprep.subr.bf16.mxu0 %v3822_v15 }
 0xd04   : > { %3291 = vmatpush3.bf16.msra.mxu1 %v3571_v6 }
 0xd05   : > { %3292 = vmatprep.subr.bf16.mxu1 %v3822_v15 }
 0xd06   : > { %3273 = vmatpush3.bf16.msra.mxu0 %v3564_v0 }
 0xd07   : > { %3274 = vmatprep.subr.bf16.mxu0 %v3822_v15 }
 0xd08   : > { %3293 = vmatpush3.bf16.msra.mxu1 %v3572_v7 }
 0xd09   : > { %3294 = vmatprep.subr.bf16.mxu1 %v3822_v15 }
 0xd0a   : > { %3275 = vmatpush3.bf16.msra.mxu0 %v3565_v1 }
 0xd0c   : > { %3295 = vmatpush3.bf16.msra.mxu1 %v3573_v10 }
 0xd0d   : > { %3277 = vmatmul.mubr.bf16.vlgmr.msra.gmra.mxu0 %v2487_v2 }
 0xdcd   : > { %v2593_v12 = vpop.f32.mrf.mxu0 }
 0xdce   : > { %v2594_v13 = vadd.f32 %v3046_v11, %v2593_v12 }
 0xdcf   : > { %v3278_v14 = vpop.f32.mrf.mxu0 }
 0xdd0   : > { %3574 = vtanh.f32 %v2594_v13 }
 0xdd1   : > { %v2596_v17 = vpop.f32.mrf.mxu0 }
 0xdd2   : > { %v2597_v18 = vadd.f32 %v3046_v11, %v2596_v17 }
 0xdd3   : > { %v3279_v19 = vpop.f32.mrf.mxu0 }
 0xdd4   : > { %3576 = vtanh.f32 %v2597_v18 }
 0xddd   : > { %v3575_v52 = vpop.eup %3574 }
 0xde1   : > { %v3577_v23 = vpop.eup %3576 }
 0xde2   : > { %v2602_v24 = vpack.c.bf16 %v3577_v23, %v3575_v52 }
 0xde4   : > { %3297 = vmatmul.mubr.bf16.vlgmr.msra.gmra.mxu1 %v2602_v24 }
 0xea4   : > { %v2708_v26 = vpop.f32.mrf.mxu1 }
 0xea5   : > { %v2709_v27 = vadd.f32 %v3055_v25, %v2708_v26 }
 0xea6   : > { %v3298_v28 = vpop.f32.mrf.mxu1 }
 0xea7   : > { %v2715_v29 = vsub.f32 0.0, %v2709_v27 }
 0xea8   : > { %v2711_v40 = vpop.f32.mrf.mxu1 }
 0xea9   : > { %v2717_v30 = vmul.f32 1.442695, %v2715_v29  ;;  %v2712_v31 = vadd.f32 %v3055_v25, %v2711_v40 }
 0xeaa   : > { %v3299_v32 = vpop.f32.mrf.mxu1 }
 0xeab   : > { %3578 = vpow2.f32 %v2717_v30  ;;  %v2716_v33 = vsub.f32 0.0, %v2712_v31 }
 0xead   : > { %v2719_v34 = vmul.f32 1.442695, %v2716_v33 }
 0xeaf   : > { %3580 = vpow2.f32 %v2719_v34 }
 0xeb8   : > { %v3579_v35 = vpop.eup %3578 }
 0xeb9   : > { %v2721_v36 = vadd.f32 1.0, %v3579_v35 }
 0xebb   : > { %3582 = vrcp.f32 %v2721_v36 }
 0xebc   : > { %v3581_v37 = vpop.eup %3580 }
 0xebd   : > { %v2722_v38 = vadd.f32 1.0, %v3581_v37 }
 0xebf   : > { %3584 = vrcp.f32 %v2722_v38 }
 0xec8   : > { %v3583_v39 = vpop.eup %3582 }
 0xec9   : > { %2727 = vst [vmem:[%s4606_s25] sm:$0x1] %v3583_v39 }
 0xecc   : > { %v3585_v41 = vpop.eup %3584 }
 0xecd   : > { %2728 = vst [vmem:[%s4606_s25 + $0x1] sm:$0x1] %v3585_v41 }
 0xece PF: > { %s4607_s30 = sld [smem:[#allocation19_spill]]  ;;  %s4610_s3 = smov %s3790_s28 }
 0xecf   : > { %s4608_s23 = sld [smem:[#allocation18_spill]] }
 0xed0   : > { %s4609_s29 = sld [smem:[#allocation20_spill]] }
 0xed4   : > { %p37_p11 = scmp.ge.s32.totalorder %s4607_s30, 4  }
 0xed5   : > { %s4611_s28 = smov %s4608_s23 }
 0xed6   :  { %39 = sbr.rel (!%p37_p11) target bundleno = 27 (0x1b), region = 216 }
 0xedb   :  { %2740 = vsyncpa [#allocation4], 1 }
 0xedc   :  { %2742 = vsyncpa [#allocation4 + $0x1], 1 }
 0xedd   :  { %2743 = vsyncpa [#allocation6], 1 }
 0xede   :  { %2745 = vsyncpa [#allocation6 + $0x1], 1 }
 0xedf   :  { %2746 = vsyncpa [#allocation9], 1 }
 0xee0   :  { %2748 = vsyncpa [#allocation9 + $0x1], 1 }
 0xee1   :  { %2749 = vsyncpa [#allocation12], 1 }

</bundles_post_ra>
